<compile_context>
chip_gen: v6e
topology: v6e:2x2x1
jax: 0.10.0
libtpu: 0.0.40
codegen_flags: <defaults>
</compile_context>

<pallas_src>
import functools

import jax
import jax.numpy as jnp
from jax.experimental import pallas as pl
from jax.experimental.pallas import tpu as pltpu


# ----------------------------------------------------------------------------
# Fully fused kernel: all LSTM layers + regression head in one invocation.
# ----------------------------------------------------------------------------
def make_fused_kernel(num_layers, seq_len, batch_pad, hid):
    H = hid
    B = batch_pad          # padded to a multiple of 8 (one sublane tile)
    S = seq_len

    def kernel(*refs):
        # refs = [x, (w_ih_t, w_hh_t, bias) * L, w1_t, b1, w2_t, b2, out]
        x_ref = refs[0]
        lw = refs[1:1 + 3 * num_layers]
        hw1_ref, hb1_ref, hw2_ref, hb2_ref = refs[1 + 3 * num_layers:5 + 3 * num_layers]
        o_ref = refs[5 + 3 * num_layers]

        inp = x_ref[...]                                     # (S*B, in_d) for layer 0
        h = None
        for l in range(num_layers):
            w_ih_t = lw[3 * l][...]                          # (in_d, 4H)
            w_hh_t = lw[3 * l + 1][...]                      # (H,    4H)
            bias = lw[3 * l + 2][...]                        # (1,    4H)

            # Hoisted input projection + bias for ALL timesteps: one MXU matmul
            # + one full-slab add, entirely off the serial recurrent path.
            xg = jnp.dot(inp, w_ih_t,
                         preferred_element_type=jnp.float32) + bias   # (S*B, 4H)

            h = jnp.zeros((B, H), jnp.float32)
            c = jnp.zeros((B, H), jnp.float32)
            hs = []
            for t in range(S):                               # static unroll, S small
                # B == 8 -> this slice is exactly one (8,128) vreg (unmasked).
                gates = xg[t * B:(t + 1) * B, :] + jnp.dot(
                    h, w_hh_t, preferred_element_type=jnp.float32)    # (B, 4H)
                # Full-width EUP ops once, then cheap 32-lane slices.
                # PyTorch gate order: i, f, g, o.
                sg = jax.nn.sigmoid(gates)
                th = jnp.tanh(gates)
                i_g = sg[:, 0 * H:1 * H]
                f_g = sg[:, 1 * H:2 * H]
                g_g = th[:, 2 * H:3 * H]
                o_g = sg[:, 3 * H:4 * H]
                c = f_g * c + i_g * g_g
                h = o_g * jnp.tanh(c)
                if l < num_layers - 1:
                    hs.append(h)
            if l < num_layers - 1:
                # Next layer's (S*B, H) input, kept in vregs (no VMEM slab,
                # no masked per-step stores on the recurrent path).
                inp = jnp.concatenate(hs, axis=0)

        # Regression head on the last timestep of the last layer:
        # sigmoid(sigmoid(h @ W1^T + b1) @ W2^T + b2)
        z1 = jax.nn.sigmoid(
            jnp.dot(h, hw1_ref[...], preferred_element_type=jnp.float32)
            + hb1_ref[...]
        )
        o_ref[...] = jax.nn.sigmoid(
            jnp.dot(z1, hw2_ref[...], preferred_element_type=jnp.float32)
            + hb2_ref[...]
        )

    return kernel


def fused_forward(x, params):
    """x: (S, B, I); params as produced by init_params. Returns (B, out_dim)."""
    S, B, I = x.shape
    L = len(params["lstm"])
    H = params["lstm"][0]["w_hh_t"].shape[0]
    O = params["reg"]["w2_t"].shape[1]

    # Pad batch up to one full sublane tile (8 rows); padded rows are zero and
    # never mix with real rows (all per-row math), sliced off below.
    B_pad = ((B + 7) // 8) * 8
    if B_pad != B:
        x = jnp.pad(x, ((0, 0), (0, B_pad - B), (0, 0)))

    kernel = make_fused_kernel(L, S, B_pad, H)

    flat_inputs = [x.reshape(S * B_pad, I)]
    for layer in params["lstm"]:
        flat_inputs += [layer["w_ih_t"], layer["w_hh_t"], layer["bias"]]
    flat_inputs += [params["reg"]["w1_t"], params["reg"]["b1"],
                    params["reg"]["w2_t"], params["reg"]["b2"]]

    vmem_spec = pl.BlockSpec(memory_space=pltpu.MemorySpace.VMEM)
    out = pl.pallas_call(
        kernel,
        out_shape=jax.ShapeDtypeStruct((B_pad, O), jnp.float32),
        in_specs=[vmem_spec] * len(flat_inputs),
        out_specs=vmem_spec,
        compiler_params=pltpu.CompilerParams(
            # Total footprint ~100 KiB; 4 MiB documents the headroom and keeps
            # the kernel well under v7x's 64 MiB physical / 32 MiB scoped VMEM.
            vmem_limit_bytes=4 * 1024 * 1024,
        ),
    )(*flat_inputs)
    return out[:B]


# ----------------------------------------------------------------------------
# Full model forward (single fused pallas_call)
# ----------------------------------------------------------------------------
@functools.partial(jax.jit, static_argnums=())
def model_forward(x, params):
    return fused_forward(x, params)


def init_params(key, inp_dim, out_dim, mid_dim, mid_layers):
    """Deterministic init mirroring the PyTorch module's parameter shapes."""
    keys = jax.random.split(key, 4 * mid_layers + 4)
    scale = 1.0 / jnp.sqrt(mid_dim)
    lstm = []
    k_i = 0
    for layer in range(mid_layers):
        in_d = inp_dim if layer == 0 else mid_dim
        w_ih = jax.random.uniform(keys[k_i], (4 * mid_dim, in_d), jnp.float32,
                                  -scale, scale); k_i += 1
        w_hh = jax.random.uniform(keys[k_i], (4 * mid_dim, mid_dim), jnp.float32,
                                  -scale, scale); k_i += 1
        b_ih = jax.random.uniform(keys[k_i], (4 * mid_dim,), jnp.float32,
                                  -scale, scale); k_i += 1
        b_hh = jax.random.uniform(keys[k_i], (4 * mid_dim,), jnp.float32,
                                  -scale, scale); k_i += 1
        lstm.append({
            "w_ih_t": w_ih.T,                      # (in_d, 4H)
            "w_hh_t": w_hh.T,                      # (H, 4H)
            "bias": (b_ih + b_hh)[None, :],        # (1, 4H)
        })
    w1 = jax.random.uniform(keys[k_i], (mid_dim, mid_dim), jnp.float32,
                            -scale, scale); k_i += 1
    b1 = jax.random.uniform(keys[k_i], (mid_dim,), jnp.float32,
                            -scale, scale); k_i += 1
    w2 = jax.random.uniform(keys[k_i], (out_dim, mid_dim), jnp.float32,
                            -scale, scale); k_i += 1
    b2 = jax.random.uniform(keys[k_i], (out_dim,), jnp.float32,
                            -scale, scale); k_i += 1
    reg = {"w1_t": w1.T, "b1": b1[None, :], "w2_t": w2.T, "b2": b2[None, :]}
    return {"lstm": lstm, "reg": reg}


# ----------------------------------------------------------------------------
# Pure-JAX reference (for verification)
# ----------------------------------------------------------------------------
def reference_forward(x, params):
    y = x
    for layer in params["lstm"]:
        S, B, _ = y.shape
        H = layer["w_hh_t"].shape[0]

        def step(carry, x_t):
            h, c = carry
            gates = x_t @ layer["w_ih_t"] + h @ layer["w_hh_t"] + layer["bias"]
            i = jax.nn.sigmoid(gates[:, 0 * H:1 * H])
            f = jax.nn.sigmoid(gates[:, 1 * H:2 * H])
            g = jnp.tanh(gates[:, 2 * H:3 * H])
            o = jax.nn.sigmoid(gates[:, 3 * H:4 * H])
            c = f * c + i * g
            h = o * jnp.tanh(c)
            return (h, c), h

        init = (jnp.zeros((B, H), jnp.float32), jnp.zeros((B, H), jnp.float32))
        _, y = jax.lax.scan(step, init, y)
    h_last = y[-1]
    z1 = jax.nn.sigmoid(h_last @ params["reg"]["w1_t"] + params["reg"]["b1"])
    return jax.nn.sigmoid(z1 @ params["reg"]["w2_t"] + params["reg"]["b2"])


if __name__ == "__main__":
    # Model(inp_dim=16, out_dim=8, mid_dim=32, mid_layers=2); x: (seq=8, batch=4, 16)
    inp_dim, out_dim, mid_dim, mid_layers = 16, 8, 32, 2
    seq_len, batch = 8, 4

    key = jax.random.PRNGKey(0)
    k_params, k_x = jax.random.split(key)
    params = init_params(k_params, inp_dim, out_dim, mid_dim, mid_layers)
    x = jax.random.normal(k_x, (seq_len, batch, inp_dim), jnp.float32)

    out = model_forward(x, params)
    out = jax.block_until_ready(out)

    ref = reference_forward(x, params)
    assert out.shape == (batch, out_dim)
    assert jnp.allclose(out, ref, atol=1e-5, rtol=1e-5), "mismatch vs reference"

    print("KERNEL_OK")
</pallas_src>

<mosaic_0001>
module attributes {stable_mosaic.version = 11 : i64} {
  func.func @kernel(%arg0: memref<64x16xf32, #tpu.memory_space<vmem>>, %arg1: memref<16x128xf32, #tpu.memory_space<vmem>>, %arg2: memref<32x128xf32, #tpu.memory_space<vmem>>, %arg3: memref<1x128xf32, #tpu.memory_space<vmem>>, %arg4: memref<32x128xf32, #tpu.memory_space<vmem>>, %arg5: memref<32x128xf32, #tpu.memory_space<vmem>>, %arg6: memref<1x128xf32, #tpu.memory_space<vmem>>, %arg7: memref<32x32xf32, #tpu.memory_space<vmem>>, %arg8: memref<1x32xf32, #tpu.memory_space<vmem>>, %arg9: memref<32x8xf32, #tpu.memory_space<vmem>>, %arg10: memref<1x8xf32, #tpu.memory_space<vmem>>, %arg11: memref<8x8xf32, #tpu.memory_space<vmem>>) attributes {dimension_semantics = [], scalar_prefetch = 0 : i64, scratch_operands = 0 : i64, tpu.core_type = #tpu.core_type<tc>} {
    %c0 = arith.constant 0 : index
    %c0_0 = arith.constant 0 : index
    %0 = vector.load %arg0[%c0, %c0_0] : memref<64x16xf32, #tpu.memory_space<vmem>>, vector<64x16xf32>
    %c0_1 = arith.constant 0 : index
    %c0_2 = arith.constant 0 : index
    %1 = vector.load %arg1[%c0_1, %c0_2] : memref<16x128xf32, #tpu.memory_space<vmem>>, vector<16x128xf32>
    %c0_3 = arith.constant 0 : index
    %c0_4 = arith.constant 0 : index
    %2 = vector.load %arg2[%c0_3, %c0_4] : memref<32x128xf32, #tpu.memory_space<vmem>>, vector<32x128xf32>
    %c0_5 = arith.constant 0 : index
    %c0_6 = arith.constant 0 : index
    %3 = vector.load %arg3[%c0_5, %c0_6] : memref<1x128xf32, #tpu.memory_space<vmem>>, vector<1x128xf32>
    %cst = arith.constant dense<0.000000e+00> : vector<64x128xf32>
    %4 = tpu.matmul %0, %1, %cst {dimension_numbers = #tpu.dot_dimension_numbers<[1], [0], [0], [1], [0, 0, 1, 1], [], []>} : vector<64x16xf32>, vector<16x128xf32>, vector<64x128xf32> -> vector<64x128xf32>
    %5 = vector.broadcast %3 : vector<1x128xf32> to vector<64x128xf32>
    %6 = arith.addf %4, %5 : vector<64x128xf32>
    %cst_7 = arith.constant 0.000000e+00 : f32
    %7 = vector.broadcast %cst_7 : f32 to vector<8x32xf32>
    %cst_8 = arith.constant 0.000000e+00 : f32
    %8 = vector.broadcast %cst_8 : f32 to vector<8x32xf32>
    %9 = vector.extract_strided_slice %6 {offsets = [0, 0], sizes = [8, 128], strides = [1, 1]} : vector<64x128xf32> to vector<8x128xf32>
    %cst_9 = arith.constant dense<0.000000e+00> : vector<8x128xf32>
    %10 = tpu.matmul %7, %2, %cst_9 {dimension_numbers = #tpu.dot_dimension_numbers<[1], [0], [0], [1], [0, 0, 1, 1], [], []>} : vector<8x32xf32>, vector<32x128xf32>, vector<8x128xf32> -> vector<8x128xf32>
    %11 = arith.addf %9, %10 : vector<8x128xf32>
    %12 = arith.negf %11 : vector<8x128xf32>
    %13 = math.exp %12 : vector<8x128xf32>
    %cst_10 = arith.constant 1.000000e+00 : f32
    %14 = vector.broadcast %cst_10 : f32 to vector<8x128xf32>
    %15 = arith.addf %14, %13 : vector<8x128xf32>
    %16 = arith.divf %14, %15 : vector<8x128xf32>
    %17 = math.tanh %11 : vector<8x128xf32>
    %18 = vector.extract_strided_slice %16 {offsets = [0, 0], sizes = [8, 32], strides = [1, 1]} : vector<8x128xf32> to vector<8x32xf32>
    %19 = vector.extract_strided_slice %16 {offsets = [0, 32], sizes = [8, 32], strides = [1, 1]} : vector<8x128xf32> to vector<8x32xf32>
    %20 = vector.extract_strided_slice %17 {offsets = [0, 64], sizes = [8, 32], strides = [1, 1]} : vector<8x128xf32> to vector<8x32xf32>
    %21 = vector.extract_strided_slice %16 {offsets = [0, 96], sizes = [8, 32], strides = [1, 1]} : vector<8x128xf32> to vector<8x32xf32>
    %22 = arith.mulf %19, %8 : vector<8x32xf32>
    %23 = arith.mulf %18, %20 : vector<8x32xf32>
    %24 = arith.addf %22, %23 : vector<8x32xf32>
    %25 = math.tanh %24 : vector<8x32xf32>
    %26 = arith.mulf %21, %25 : vector<8x32xf32>
    %27 = vector.extract_strided_slice %6 {offsets = [8, 0], sizes = [8, 128], strides = [1, 1]} : vector<64x128xf32> to vector<8x128xf32>
    %cst_11 = arith.constant dense<0.000000e+00> : vector<8x128xf32>
    %28 = tpu.matmul %26, %2, %cst_11 {dimension_numbers = #tpu.dot_dimension_numbers<[1], [0], [0], [1], [0, 0, 1, 1], [], []>} : vector<8x32xf32>, vector<32x128xf32>, vector<8x128xf32> -> vector<8x128xf32>
    %29 = arith.addf %27, %28 : vector<8x128xf32>
    %30 = arith.negf %29 : vector<8x128xf32>
    %31 = math.exp %30 : vector<8x128xf32>
    %cst_12 = arith.constant 1.000000e+00 : f32
    %32 = vector.broadcast %cst_12 : f32 to vector<8x128xf32>
    %33 = arith.addf %32, %31 : vector<8x128xf32>
    %34 = arith.divf %32, %33 : vector<8x128xf32>
    %35 = math.tanh %29 : vector<8x128xf32>
    %36 = vector.extract_strided_slice %34 {offsets = [0, 0], sizes = [8, 32], strides = [1, 1]} : vector<8x128xf32> to vector<8x32xf32>
    %37 = vector.extract_strided_slice %34 {offsets = [0, 32], sizes = [8, 32], strides = [1, 1]} : vector<8x128xf32> to vector<8x32xf32>
    %38 = vector.extract_strided_slice %35 {offsets = [0, 64], sizes = [8, 32], strides = [1, 1]} : vector<8x128xf32> to vector<8x32xf32>
    %39 = vector.extract_strided_slice %34 {offsets = [0, 96], sizes = [8, 32], strides = [1, 1]} : vector<8x128xf32> to vector<8x32xf32>
    %40 = arith.mulf %37, %24 : vector<8x32xf32>
    %41 = arith.mulf %36, %38 : vector<8x32xf32>
    %42 = arith.addf %40, %41 : vector<8x32xf32>
    %43 = math.tanh %42 : vector<8x32xf32>
    %44 = arith.mulf %39, %43 : vector<8x32xf32>
    %45 = vector.extract_strided_slice %6 {offsets = [16, 0], sizes = [8, 128], strides = [1, 1]} : vector<64x128xf32> to vector<8x128xf32>
    %cst_13 = arith.constant dense<0.000000e+00> : vector<8x128xf32>
    %46 = tpu.matmul %44, %2, %cst_13 {dimension_numbers = #tpu.dot_dimension_numbers<[1], [0], [0], [1], [0, 0, 1, 1], [], []>} : vector<8x32xf32>, vector<32x128xf32>, vector<8x128xf32> -> vector<8x128xf32>
    %47 = arith.addf %45, %46 : vector<8x128xf32>
    %48 = arith.negf %47 : vector<8x128xf32>
    %49 = math.exp %48 : vector<8x128xf32>
    %cst_14 = arith.constant 1.000000e+00 : f32
    %50 = vector.broadcast %cst_14 : f32 to vector<8x128xf32>
    %51 = arith.addf %50, %49 : vector<8x128xf32>
    %52 = arith.divf %50, %51 : vector<8x128xf32>
    %53 = math.tanh %47 : vector<8x128xf32>
    %54 = vector.extract_strided_slice %52 {offsets = [0, 0], sizes = [8, 32], strides = [1, 1]} : vector<8x128xf32> to vector<8x32xf32>
    %55 = vector.extract_strided_slice %52 {offsets = [0, 32], sizes = [8, 32], strides = [1, 1]} : vector<8x128xf32> to vector<8x32xf32>
    %56 = vector.extract_strided_slice %53 {offsets = [0, 64], sizes = [8, 32], strides = [1, 1]} : vector<8x128xf32> to vector<8x32xf32>
    %57 = vector.extract_strided_slice %52 {offsets = [0, 96], sizes = [8, 32], strides = [1, 1]} : vector<8x128xf32> to vector<8x32xf32>
    %58 = arith.mulf %55, %42 : vector<8x32xf32>
    %59 = arith.mulf %54, %56 : vector<8x32xf32>
    %60 = arith.addf %58, %59 : vector<8x32xf32>
    %61 = math.tanh %60 : vector<8x32xf32>
    %62 = arith.mulf %57, %61 : vector<8x32xf32>
    %63 = vector.extract_strided_slice %6 {offsets = [24, 0], sizes = [8, 128], strides = [1, 1]} : vector<64x128xf32> to vector<8x128xf32>
    %cst_15 = arith.constant dense<0.000000e+00> : vector<8x128xf32>
    %64 = tpu.matmul %62, %2, %cst_15 {dimension_numbers = #tpu.dot_dimension_numbers<[1], [0], [0], [1], [0, 0, 1, 1], [], []>} : vector<8x32xf32>, vector<32x128xf32>, vector<8x128xf32> -> vector<8x128xf32>
    %65 = arith.addf %63, %64 : vector<8x128xf32>
    %66 = arith.negf %65 : vector<8x128xf32>
    %67 = math.exp %66 : vector<8x128xf32>
    %cst_16 = arith.constant 1.000000e+00 : f32
    %68 = vector.broadcast %cst_16 : f32 to vector<8x128xf32>
    %69 = arith.addf %68, %67 : vector<8x128xf32>
    %70 = arith.divf %68, %69 : vector<8x128xf32>
    %71 = math.tanh %65 : vector<8x128xf32>
    %72 = vector.extract_strided_slice %70 {offsets = [0, 0], sizes = [8, 32], strides = [1, 1]} : vector<8x128xf32> to vector<8x32xf32>
    %73 = vector.extract_strided_slice %70 {offsets = [0, 32], sizes = [8, 32], strides = [1, 1]} : vector<8x128xf32> to vector<8x32xf32>
    %74 = vector.extract_strided_slice %71 {offsets = [0, 64], sizes = [8, 32], strides = [1, 1]} : vector<8x128xf32> to vector<8x32xf32>
    %75 = vector.extract_strided_slice %70 {offsets = [0, 96], sizes = [8, 32], strides = [1, 1]} : vector<8x128xf32> to vector<8x32xf32>
    %76 = arith.mulf %73, %60 : vector<8x32xf32>
    %77 = arith.mulf %72, %74 : vector<8x32xf32>
    %78 = arith.addf %76, %77 : vector<8x32xf32>
    %79 = math.tanh %78 : vector<8x32xf32>
    %80 = arith.mulf %75, %79 : vector<8x32xf32>
    %81 = vector.extract_strided_slice %6 {offsets = [32, 0], sizes = [8, 128], strides = [1, 1]} : vector<64x128xf32> to vector<8x128xf32>
    %cst_17 = arith.constant dense<0.000000e+00> : vector<8x128xf32>
    %82 = tpu.matmul %80, %2, %cst_17 {dimension_numbers = #tpu.dot_dimension_numbers<[1], [0], [0], [1], [0, 0, 1, 1], [], []>} : vector<8x32xf32>, vector<32x128xf32>, vector<8x128xf32> -> vector<8x128xf32>
    %83 = arith.addf %81, %82 : vector<8x128xf32>
    %84 = arith.negf %83 : vector<8x128xf32>
    %85 = math.exp %84 : vector<8x128xf32>
    %cst_18 = arith.constant 1.000000e+00 : f32
    %86 = vector.broadcast %cst_18 : f32 to vector<8x128xf32>
    %87 = arith.addf %86, %85 : vector<8x128xf32>
    %88 = arith.divf %86, %87 : vector<8x128xf32>
    %89 = math.tanh %83 : vector<8x128xf32>
    %90 = vector.extract_strided_slice %88 {offsets = [0, 0], sizes = [8, 32], strides = [1, 1]} : vector<8x128xf32> to vector<8x32xf32>
    %91 = vector.extract_strided_slice %88 {offsets = [0, 32], sizes = [8, 32], strides = [1, 1]} : vector<8x128xf32> to vector<8x32xf32>
    %92 = vector.extract_strided_slice %89 {offsets = [0, 64], sizes = [8, 32], strides = [1, 1]} : vector<8x128xf32> to vector<8x32xf32>
    %93 = vector.extract_strided_slice %88 {offsets = [0, 96], sizes = [8, 32], strides = [1, 1]} : vector<8x128xf32> to vector<8x32xf32>
    %94 = arith.mulf %91, %78 : vector<8x32xf32>
    %95 = arith.mulf %90, %92 : vector<8x32xf32>
    %96 = arith.addf %94, %95 : vector<8x32xf32>
    %97 = math.tanh %96 : vector<8x32xf32>
    %98 = arith.mulf %93, %97 : vector<8x32xf32>
    %99 = vector.extract_strided_slice %6 {offsets = [40, 0], sizes = [8, 128], strides = [1, 1]} : vector<64x128xf32> to vector<8x128xf32>
    %cst_19 = arith.constant dense<0.000000e+00> : vector<8x128xf32>
    %100 = tpu.matmul %98, %2, %cst_19 {dimension_numbers = #tpu.dot_dimension_numbers<[1], [0], [0], [1], [0, 0, 1, 1], [], []>} : vector<8x32xf32>, vector<32x128xf32>, vector<8x128xf32> -> vector<8x128xf32>
    %101 = arith.addf %99, %100 : vector<8x128xf32>
    %102 = arith.negf %101 : vector<8x128xf32>
    %103 = math.exp %102 : vector<8x128xf32>
    %cst_20 = arith.constant 1.000000e+00 : f32
    %104 = vector.broadcast %cst_20 : f32 to vector<8x128xf32>
    %105 = arith.addf %104, %103 : vector<8x128xf32>
    %106 = arith.divf %104, %105 : vector<8x128xf32>
    %107 = math.tanh %101 : vector<8x128xf32>
    %108 = vector.extract_strided_slice %106 {offsets = [0, 0], sizes = [8, 32], strides = [1, 1]} : vector<8x128xf32> to vector<8x32xf32>
    %109 = vector.extract_strided_slice %106 {offsets = [0, 32], sizes = [8, 32], strides = [1, 1]} : vector<8x128xf32> to vector<8x32xf32>
    %110 = vector.extract_strided_slice %107 {offsets = [0, 64], sizes = [8, 32], strides = [1, 1]} : vector<8x128xf32> to vector<8x32xf32>
    %111 = vector.extract_strided_slice %106 {offsets = [0, 96], sizes = [8, 32], strides = [1, 1]} : vector<8x128xf32> to vector<8x32xf32>
    %112 = arith.mulf %109, %96 : vector<8x32xf32>
    %113 = arith.mulf %108, %110 : vector<8x32xf32>
    %114 = arith.addf %112, %113 : vector<8x32xf32>
    %115 = math.tanh %114 : vector<8x32xf32>
    %116 = arith.mulf %111, %115 : vector<8x32xf32>
    %117 = vector.extract_strided_slice %6 {offsets = [48, 0], sizes = [8, 128], strides = [1, 1]} : vector<64x128xf32> to vector<8x128xf32>
    %cst_21 = arith.constant dense<0.000000e+00> : vector<8x128xf32>
    %118 = tpu.matmul %116, %2, %cst_21 {dimension_numbers = #tpu.dot_dimension_numbers<[1], [0], [0], [1], [0, 0, 1, 1], [], []>} : vector<8x32xf32>, vector<32x128xf32>, vector<8x128xf32> -> vector<8x128xf32>
    %119 = arith.addf %117, %118 : vector<8x128xf32>
    %120 = arith.negf %119 : vector<8x128xf32>
    %121 = math.exp %120 : vector<8x128xf32>
    %cst_22 = arith.constant 1.000000e+00 : f32
    %122 = vector.broadcast %cst_22 : f32 to vector<8x128xf32>
    %123 = arith.addf %122, %121 : vector<8x128xf32>
    %124 = arith.divf %122, %123 : vector<8x128xf32>
    %125 = math.tanh %119 : vector<8x128xf32>
    %126 = vector.extract_strided_slice %124 {offsets = [0, 0], sizes = [8, 32], strides = [1, 1]} : vector<8x128xf32> to vector<8x32xf32>
    %127 = vector.extract_strided_slice %124 {offsets = [0, 32], sizes = [8, 32], strides = [1, 1]} : vector<8x128xf32> to vector<8x32xf32>
    %128 = vector.extract_strided_slice %125 {offsets = [0, 64], sizes = [8, 32], strides = [1, 1]} : vector<8x128xf32> to vector<8x32xf32>
    %129 = vector.extract_strided_slice %124 {offsets = [0, 96], sizes = [8, 32], strides = [1, 1]} : vector<8x128xf32> to vector<8x32xf32>
    %130 = arith.mulf %127, %114 : vector<8x32xf32>
    %131 = arith.mulf %126, %128 : vector<8x32xf32>
    %132 = arith.addf %130, %131 : vector<8x32xf32>
    %133 = math.tanh %132 : vector<8x32xf32>
    %134 = arith.mulf %129, %133 : vector<8x32xf32>
    %135 = vector.extract_strided_slice %6 {offsets = [56, 0], sizes = [8, 128], strides = [1, 1]} : vector<64x128xf32> to vector<8x128xf32>
    %cst_23 = arith.constant dense<0.000000e+00> : vector<8x128xf32>
    %136 = tpu.matmul %134, %2, %cst_23 {dimension_numbers = #tpu.dot_dimension_numbers<[1], [0], [0], [1], [0, 0, 1, 1], [], []>} : vector<8x32xf32>, vector<32x128xf32>, vector<8x128xf32> -> vector<8x128xf32>
    %137 = arith.addf %135, %136 : vector<8x128xf32>
    %138 = arith.negf %137 : vector<8x128xf32>
    %139 = math.exp %138 : vector<8x128xf32>
    %cst_24 = arith.constant 1.000000e+00 : f32
    %140 = vector.broadcast %cst_24 : f32 to vector<8x128xf32>
    %141 = arith.addf %140, %139 : vector<8x128xf32>
    %142 = arith.divf %140, %141 : vector<8x128xf32>
    %143 = math.tanh %137 : vector<8x128xf32>
    %144 = vector.extract_strided_slice %142 {offsets = [0, 0], sizes = [8, 32], strides = [1, 1]} : vector<8x128xf32> to vector<8x32xf32>
    %145 = vector.extract_strided_slice %142 {offsets = [0, 32], sizes = [8, 32], strides = [1, 1]} : vector<8x128xf32> to vector<8x32xf32>
    %146 = vector.extract_strided_slice %143 {offsets = [0, 64], sizes = [8, 32], strides = [1, 1]} : vector<8x128xf32> to vector<8x32xf32>
    %147 = vector.extract_strided_slice %142 {offsets = [0, 96], sizes = [8, 32], strides = [1, 1]} : vector<8x128xf32> to vector<8x32xf32>
    %148 = arith.mulf %145, %132 : vector<8x32xf32>
    %149 = arith.mulf %144, %146 : vector<8x32xf32>
    %150 = arith.addf %148, %149 : vector<8x32xf32>
    %151 = math.tanh %150 : vector<8x32xf32>
    %152 = arith.mulf %147, %151 : vector<8x32xf32>
    %153 = tpu.concatenate %26, %44, %62, %80, %98, %116, %134, %152 in 0 : vector<8x32xf32>, vector<8x32xf32>, vector<8x32xf32>, vector<8x32xf32>, vector<8x32xf32>, vector<8x32xf32>, vector<8x32xf32>, vector<8x32xf32> -> vector<64x32xf32>
    %c0_25 = arith.constant 0 : index
    %c0_26 = arith.constant 0 : index
    %154 = vector.load %arg4[%c0_25, %c0_26] : memref<32x128xf32, #tpu.memory_space<vmem>>, vector<32x128xf32>
    %c0_27 = arith.constant 0 : index
    %c0_28 = arith.constant 0 : index
    %155 = vector.load %arg5[%c0_27, %c0_28] : memref<32x128xf32, #tpu.memory_space<vmem>>, vector<32x128xf32>
    %c0_29 = arith.constant 0 : index
    %c0_30 = arith.constant 0 : index
    %156 = vector.load %arg6[%c0_29, %c0_30] : memref<1x128xf32, #tpu.memory_space<vmem>>, vector<1x128xf32>
    %cst_31 = arith.constant dense<0.000000e+00> : vector<64x128xf32>
    %157 = tpu.matmul %153, %154, %cst_31 {dimension_numbers = #tpu.dot_dimension_numbers<[1], [0], [0], [1], [0, 0, 1, 1], [], []>} : vector<64x32xf32>, vector<32x128xf32>, vector<64x128xf32> -> vector<64x128xf32>
    %158 = vector.broadcast %156 : vector<1x128xf32> to vector<64x128xf32>
    %159 = arith.addf %157, %158 : vector<64x128xf32>
    %cst_32 = arith.constant 0.000000e+00 : f32
    %160 = vector.broadcast %cst_32 : f32 to vector<8x32xf32>
    %cst_33 = arith.constant 0.000000e+00 : f32
    %161 = vector.broadcast %cst_33 : f32 to vector<8x32xf32>
    %162 = vector.extract_strided_slice %159 {offsets = [0, 0], sizes = [8, 128], strides = [1, 1]} : vector<64x128xf32> to vector<8x128xf32>
    %cst_34 = arith.constant dense<0.000000e+00> : vector<8x128xf32>
    %163 = tpu.matmul %160, %155, %cst_34 {dimension_numbers = #tpu.dot_dimension_numbers<[1], [0], [0], [1], [0, 0, 1, 1], [], []>} : vector<8x32xf32>, vector<32x128xf32>, vector<8x128xf32> -> vector<8x128xf32>
    %164 = arith.addf %162, %163 : vector<8x128xf32>
    %165 = arith.negf %164 : vector<8x128xf32>
    %166 = math.exp %165 : vector<8x128xf32>
    %cst_35 = arith.constant 1.000000e+00 : f32
    %167 = vector.broadcast %cst_35 : f32 to vector<8x128xf32>
    %168 = arith.addf %167, %166 : vector<8x128xf32>
    %169 = arith.divf %167, %168 : vector<8x128xf32>
    %170 = math.tanh %164 : vector<8x128xf32>
    %171 = vector.extract_strided_slice %169 {offsets = [0, 0], sizes = [8, 32], strides = [1, 1]} : vector<8x128xf32> to vector<8x32xf32>
    %172 = vector.extract_strided_slice %169 {offsets = [0, 32], sizes = [8, 32], strides = [1, 1]} : vector<8x128xf32> to vector<8x32xf32>
    %173 = vector.extract_strided_slice %170 {offsets = [0, 64], sizes = [8, 32], strides = [1, 1]} : vector<8x128xf32> to vector<8x32xf32>
    %174 = vector.extract_strided_slice %169 {offsets = [0, 96], sizes = [8, 32], strides = [1, 1]} : vector<8x128xf32> to vector<8x32xf32>
    %175 = arith.mulf %172, %161 : vector<8x32xf32>
    %176 = arith.mulf %171, %173 : vector<8x32xf32>
    %177 = arith.addf %175, %176 : vector<8x32xf32>
    %178 = math.tanh %177 : vector<8x32xf32>
    %179 = arith.mulf %174, %178 : vector<8x32xf32>
    %180 = vector.extract_strided_slice %159 {offsets = [8, 0], sizes = [8, 128], strides = [1, 1]} : vector<64x128xf32> to vector<8x128xf32>
    %cst_36 = arith.constant dense<0.000000e+00> : vector<8x128xf32>
    %181 = tpu.matmul %179, %155, %cst_36 {dimension_numbers = #tpu.dot_dimension_numbers<[1], [0], [0], [1], [0, 0, 1, 1], [], []>} : vector<8x32xf32>, vector<32x128xf32>, vector<8x128xf32> -> vector<8x128xf32>
    %182 = arith.addf %180, %181 : vector<8x128xf32>
    %183 = arith.negf %182 : vector<8x128xf32>
    %184 = math.exp %183 : vector<8x128xf32>
    %cst_37 = arith.constant 1.000000e+00 : f32
    %185 = vector.broadcast %cst_37 : f32 to vector<8x128xf32>
    %186 = arith.addf %185, %184 : vector<8x128xf32>
    %187 = arith.divf %185, %186 : vector<8x128xf32>
    %188 = math.tanh %182 : vector<8x128xf32>
    %189 = vector.extract_strided_slice %187 {offsets = [0, 0], sizes = [8, 32], strides = [1, 1]} : vector<8x128xf32> to vector<8x32xf32>
    %190 = vector.extract_strided_slice %187 {offsets = [0, 32], sizes = [8, 32], strides = [1, 1]} : vector<8x128xf32> to vector<8x32xf32>
    %191 = vector.extract_strided_slice %188 {offsets = [0, 64], sizes = [8, 32], strides = [1, 1]} : vector<8x128xf32> to vector<8x32xf32>
    %192 = vector.extract_strided_slice %187 {offsets = [0, 96], sizes = [8, 32], strides = [1, 1]} : vector<8x128xf32> to vector<8x32xf32>
    %193 = arith.mulf %190, %177 : vector<8x32xf32>
    %194 = arith.mulf %189, %191 : vector<8x32xf32>
    %195 = arith.addf %193, %194 : vector<8x32xf32>
    %196 = math.tanh %195 : vector<8x32xf32>
    %197 = arith.mulf %192, %196 : vector<8x32xf32>
    %198 = vector.extract_strided_slice %159 {offsets = [16, 0], sizes = [8, 128], strides = [1, 1]} : vector<64x128xf32> to vector<8x128xf32>
    %cst_38 = arith.constant dense<0.000000e+00> : vector<8x128xf32>
    %199 = tpu.matmul %197, %155, %cst_38 {dimension_numbers = #tpu.dot_dimension_numbers<[1], [0], [0], [1], [0, 0, 1, 1], [], []>} : vector<8x32xf32>, vector<32x128xf32>, vector<8x128xf32> -> vector<8x128xf32>
    %200 = arith.addf %198, %199 : vector<8x128xf32>
    %201 = arith.negf %200 : vector<8x128xf32>
    %202 = math.exp %201 : vector<8x128xf32>
    %cst_39 = arith.constant 1.000000e+00 : f32
    %203 = vector.broadcast %cst_39 : f32 to vector<8x128xf32>
    %204 = arith.addf %203, %202 : vector<8x128xf32>
    %205 = arith.divf %203, %204 : vector<8x128xf32>
    %206 = math.tanh %200 : vector<8x128xf32>
    %207 = vector.extract_strided_slice %205 {offsets = [0, 0], sizes = [8, 32], strides = [1, 1]} : vector<8x128xf32> to vector<8x32xf32>
    %208 = vector.extract_strided_slice %205 {offsets = [0, 32], sizes = [8, 32], strides = [1, 1]} : vector<8x128xf32> to vector<8x32xf32>
    %209 = vector.extract_strided_slice %206 {offsets = [0, 64], sizes = [8, 32], strides = [1, 1]} : vector<8x128xf32> to vector<8x32xf32>
    %210 = vector.extract_strided_slice %205 {offsets = [0, 96], sizes = [8, 32], strides = [1, 1]} : vector<8x128xf32> to vector<8x32xf32>
    %211 = arith.mulf %208, %195 : vector<8x32xf32>
    %212 = arith.mulf %207, %209 : vector<8x32xf32>
    %213 = arith.addf %211, %212 : vector<8x32xf32>
    %214 = math.tanh %213 : vector<8x32xf32>
    %215 = arith.mulf %210, %214 : vector<8x32xf32>
    %216 = vector.extract_strided_slice %159 {offsets = [24, 0], sizes = [8, 128], strides = [1, 1]} : vector<64x128xf32> to vector<8x128xf32>
    %cst_40 = arith.constant dense<0.000000e+00> : vector<8x128xf32>
    %217 = tpu.matmul %215, %155, %cst_40 {dimension_numbers = #tpu.dot_dimension_numbers<[1], [0], [0], [1], [0, 0, 1, 1], [], []>} : vector<8x32xf32>, vector<32x128xf32>, vector<8x128xf32> -> vector<8x128xf32>
    %218 = arith.addf %216, %217 : vector<8x128xf32>
    %219 = arith.negf %218 : vector<8x128xf32>
    %220 = math.exp %219 : vector<8x128xf32>
    %cst_41 = arith.constant 1.000000e+00 : f32
    %221 = vector.broadcast %cst_41 : f32 to vector<8x128xf32>
    %222 = arith.addf %221, %220 : vector<8x128xf32>
    %223 = arith.divf %221, %222 : vector<8x128xf32>
    %224 = math.tanh %218 : vector<8x128xf32>
    %225 = vector.extract_strided_slice %223 {offsets = [0, 0], sizes = [8, 32], strides = [1, 1]} : vector<8x128xf32> to vector<8x32xf32>
    %226 = vector.extract_strided_slice %223 {offsets = [0, 32], sizes = [8, 32], strides = [1, 1]} : vector<8x128xf32> to vector<8x32xf32>
    %227 = vector.extract_strided_slice %224 {offsets = [0, 64], sizes = [8, 32], strides = [1, 1]} : vector<8x128xf32> to vector<8x32xf32>
    %228 = vector.extract_strided_slice %223 {offsets = [0, 96], sizes = [8, 32], strides = [1, 1]} : vector<8x128xf32> to vector<8x32xf32>
    %229 = arith.mulf %226, %213 : vector<8x32xf32>
    %230 = arith.mulf %225, %227 : vector<8x32xf32>
    %231 = arith.addf %229, %230 : vector<8x32xf32>
    %232 = math.tanh %231 : vector<8x32xf32>
    %233 = arith.mulf %228, %232 : vector<8x32xf32>
    %234 = vector.extract_strided_slice %159 {offsets = [32, 0], sizes = [8, 128], strides = [1, 1]} : vector<64x128xf32> to vector<8x128xf32>
    %cst_42 = arith.constant dense<0.000000e+00> : vector<8x128xf32>
    %235 = tpu.matmul %233, %155, %cst_42 {dimension_numbers = #tpu.dot_dimension_numbers<[1], [0], [0], [1], [0, 0, 1, 1], [], []>} : vector<8x32xf32>, vector<32x128xf32>, vector<8x128xf32> -> vector<8x128xf32>
    %236 = arith.addf %234, %235 : vector<8x128xf32>
    %237 = arith.negf %236 : vector<8x128xf32>
    %238 = math.exp %237 : vector<8x128xf32>
    %cst_43 = arith.constant 1.000000e+00 : f32
    %239 = vector.broadcast %cst_43 : f32 to vector<8x128xf32>
    %240 = arith.addf %239, %238 : vector<8x128xf32>
    %241 = arith.divf %239, %240 : vector<8x128xf32>
    %242 = math.tanh %236 : vector<8x128xf32>
    %243 = vector.extract_strided_slice %241 {offsets = [0, 0], sizes = [8, 32], strides = [1, 1]} : vector<8x128xf32> to vector<8x32xf32>
    %244 = vector.extract_strided_slice %241 {offsets = [0, 32], sizes = [8, 32], strides = [1, 1]} : vector<8x128xf32> to vector<8x32xf32>
    %245 = vector.extract_strided_slice %242 {offsets = [0, 64], sizes = [8, 32], strides = [1, 1]} : vector<8x128xf32> to vector<8x32xf32>
    %246 = vector.extract_strided_slice %241 {offsets = [0, 96], sizes = [8, 32], strides = [1, 1]} : vector<8x128xf32> to vector<8x32xf32>
    %247 = arith.mulf %244, %231 : vector<8x32xf32>
    %248 = arith.mulf %243, %245 : vector<8x32xf32>
    %249 = arith.addf %247, %248 : vector<8x32xf32>
    %250 = math.tanh %249 : vector<8x32xf32>
    %251 = arith.mulf %246, %250 : vector<8x32xf32>
    %252 = vector.extract_strided_slice %159 {offsets = [40, 0], sizes = [8, 128], strides = [1, 1]} : vector<64x128xf32> to vector<8x128xf32>
    %cst_44 = arith.constant dense<0.000000e+00> : vector<8x128xf32>
    %253 = tpu.matmul %251, %155, %cst_44 {dimension_numbers = #tpu.dot_dimension_numbers<[1], [0], [0], [1], [0, 0, 1, 1], [], []>} : vector<8x32xf32>, vector<32x128xf32>, vector<8x128xf32> -> vector<8x128xf32>
    %254 = arith.addf %252, %253 : vector<8x128xf32>
    %255 = arith.negf %254 : vector<8x128xf32>
    %256 = math.exp %255 : vector<8x128xf32>
    %cst_45 = arith.constant 1.000000e+00 : f32
    %257 = vector.broadcast %cst_45 : f32 to vector<8x128xf32>
    %258 = arith.addf %257, %256 : vector<8x128xf32>
    %259 = arith.divf %257, %258 : vector<8x128xf32>
    %260 = math.tanh %254 : vector<8x128xf32>
    %261 = vector.extract_strided_slice %259 {offsets = [0, 0], sizes = [8, 32], strides = [1, 1]} : vector<8x128xf32> to vector<8x32xf32>
    %262 = vector.extract_strided_slice %259 {offsets = [0, 32], sizes = [8, 32], strides = [1, 1]} : vector<8x128xf32> to vector<8x32xf32>
    %263 = vector.extract_strided_slice %260 {offsets = [0, 64], sizes = [8, 32], strides = [1, 1]} : vector<8x128xf32> to vector<8x32xf32>
    %264 = vector.extract_strided_slice %259 {offsets = [0, 96], sizes = [8, 32], strides = [1, 1]} : vector<8x128xf32> to vector<8x32xf32>
    %265 = arith.mulf %262, %249 : vector<8x32xf32>
    %266 = arith.mulf %261, %263 : vector<8x32xf32>
    %267 = arith.addf %265, %266 : vector<8x32xf32>
    %268 = math.tanh %267 : vector<8x32xf32>
    %269 = arith.mulf %264, %268 : vector<8x32xf32>
    %270 = vector.extract_strided_slice %159 {offsets = [48, 0], sizes = [8, 128], strides = [1, 1]} : vector<64x128xf32> to vector<8x128xf32>
    %cst_46 = arith.constant dense<0.000000e+00> : vector<8x128xf32>
    %271 = tpu.matmul %269, %155, %cst_46 {dimension_numbers = #tpu.dot_dimension_numbers<[1], [0], [0], [1], [0, 0, 1, 1], [], []>} : vector<8x32xf32>, vector<32x128xf32>, vector<8x128xf32> -> vector<8x128xf32>
    %272 = arith.addf %270, %271 : vector<8x128xf32>
    %273 = arith.negf %272 : vector<8x128xf32>
    %274 = math.exp %273 : vector<8x128xf32>
    %cst_47 = arith.constant 1.000000e+00 : f32
    %275 = vector.broadcast %cst_47 : f32 to vector<8x128xf32>
    %276 = arith.addf %275, %274 : vector<8x128xf32>
    %277 = arith.divf %275, %276 : vector<8x128xf32>
    %278 = math.tanh %272 : vector<8x128xf32>
    %279 = vector.extract_strided_slice %277 {offsets = [0, 0], sizes = [8, 32], strides = [1, 1]} : vector<8x128xf32> to vector<8x32xf32>
    %280 = vector.extract_strided_slice %277 {offsets = [0, 32], sizes = [8, 32], strides = [1, 1]} : vector<8x128xf32> to vector<8x32xf32>
    %281 = vector.extract_strided_slice %278 {offsets = [0, 64], sizes = [8, 32], strides = [1, 1]} : vector<8x128xf32> to vector<8x32xf32>
    %282 = vector.extract_strided_slice %277 {offsets = [0, 96], sizes = [8, 32], strides = [1, 1]} : vector<8x128xf32> to vector<8x32xf32>
    %283 = arith.mulf %280, %267 : vector<8x32xf32>
    %284 = arith.mulf %279, %281 : vector<8x32xf32>
    %285 = arith.addf %283, %284 : vector<8x32xf32>
    %286 = math.tanh %285 : vector<8x32xf32>
    %287 = arith.mulf %282, %286 : vector<8x32xf32>
    %288 = vector.extract_strided_slice %159 {offsets = [56, 0], sizes = [8, 128], strides = [1, 1]} : vector<64x128xf32> to vector<8x128xf32>
    %cst_48 = arith.constant dense<0.000000e+00> : vector<8x128xf32>
    %289 = tpu.matmul %287, %155, %cst_48 {dimension_numbers = #tpu.dot_dimension_numbers<[1], [0], [0], [1], [0, 0, 1, 1], [], []>} : vector<8x32xf32>, vector<32x128xf32>, vector<8x128xf32> -> vector<8x128xf32>
    %290 = arith.addf %288, %289 : vector<8x128xf32>
    %291 = arith.negf %290 : vector<8x128xf32>
    %292 = math.exp %291 : vector<8x128xf32>
    %cst_49 = arith.constant 1.000000e+00 : f32
    %293 = vector.broadcast %cst_49 : f32 to vector<8x128xf32>
    %294 = arith.addf %293, %292 : vector<8x128xf32>
    %295 = arith.divf %293, %294 : vector<8x128xf32>
    %296 = math.tanh %290 : vector<8x128xf32>
    %297 = vector.extract_strided_slice %295 {offsets = [0, 0], sizes = [8, 32], strides = [1, 1]} : vector<8x128xf32> to vector<8x32xf32>
    %298 = vector.extract_strided_slice %295 {offsets = [0, 32], sizes = [8, 32], strides = [1, 1]} : vector<8x128xf32> to vector<8x32xf32>
    %299 = vector.extract_strided_slice %296 {offsets = [0, 64], sizes = [8, 32], strides = [1, 1]} : vector<8x128xf32> to vector<8x32xf32>
    %300 = vector.extract_strided_slice %295 {offsets = [0, 96], sizes = [8, 32], strides = [1, 1]} : vector<8x128xf32> to vector<8x32xf32>
    %301 = arith.mulf %298, %285 : vector<8x32xf32>
    %302 = arith.mulf %297, %299 : vector<8x32xf32>
    %303 = arith.addf %301, %302 : vector<8x32xf32>
    %304 = math.tanh %303 : vector<8x32xf32>
    %305 = arith.mulf %300, %304 : vector<8x32xf32>
    %c0_50 = arith.constant 0 : index
    %c0_51 = arith.constant 0 : index
    %306 = vector.load %arg7[%c0_50, %c0_51] : memref<32x32xf32, #tpu.memory_space<vmem>>, vector<32x32xf32>
    %cst_52 = arith.constant dense<0.000000e+00> : vector<8x32xf32>
    %307 = tpu.matmul %305, %306, %cst_52 {dimension_numbers = #tpu.dot_dimension_numbers<[1], [0], [0], [1], [0, 0, 1, 1], [], []>} : vector<8x32xf32>, vector<32x32xf32>, vector<8x32xf32> -> vector<8x32xf32>
    %c0_53 = arith.constant 0 : index
    %c0_54 = arith.constant 0 : index
    %308 = vector.load %arg8[%c0_53, %c0_54] : memref<1x32xf32, #tpu.memory_space<vmem>>, vector<1x32xf32>
    %309 = vector.broadcast %308 : vector<1x32xf32> to vector<8x32xf32>
    %310 = arith.addf %307, %309 : vector<8x32xf32>
    %311 = arith.negf %310 : vector<8x32xf32>
    %312 = math.exp %311 : vector<8x32xf32>
    %cst_55 = arith.constant 1.000000e+00 : f32
    %313 = vector.broadcast %cst_55 : f32 to vector<8x32xf32>
    %314 = arith.addf %313, %312 : vector<8x32xf32>
    %315 = arith.divf %313, %314 : vector<8x32xf32>
    %c0_56 = arith.constant 0 : index
    %c0_57 = arith.constant 0 : index
    %316 = vector.load %arg9[%c0_56, %c0_57] : memref<32x8xf32, #tpu.memory_space<vmem>>, vector<32x8xf32>
    %cst_58 = arith.constant dense<0.000000e+00> : vector<8x8xf32>
    %317 = tpu.matmul %315, %316, %cst_58 {dimension_numbers = #tpu.dot_dimension_numbers<[1], [0], [0], [1], [0, 0, 1, 1], [], []>} : vector<8x32xf32>, vector<32x8xf32>, vector<8x8xf32> -> vector<8x8xf32>
    %c0_59 = arith.constant 0 : index
    %c0_60 = arith.constant 0 : index
    %318 = vector.load %arg10[%c0_59, %c0_60] : memref<1x8xf32, #tpu.memory_space<vmem>>, vector<1x8xf32>
    %319 = vector.broadcast %318 : vector<1x8xf32> to vector<8x8xf32>
    %320 = arith.addf %317, %319 : vector<8x8xf32>
    %321 = arith.negf %320 : vector<8x8xf32>
    %322 = math.exp %321 : vector<8x8xf32>
    %cst_61 = arith.constant 1.000000e+00 : f32
    %323 = vector.broadcast %cst_61 : f32 to vector<8x8xf32>
    %324 = arith.addf %323, %322 : vector<8x8xf32>
    %325 = arith.divf %323, %324 : vector<8x8xf32>
    %c0_62 = arith.constant 0 : index
    %c0_63 = arith.constant 0 : index
    %326 = vector.load %arg11[%c0_62, %c0_63] : memref<8x8xf32, #tpu.memory_space<vmem>>, vector<8x8xf32>
    tpu.vector_store %arg11[%c0_62, %c0_63], %325 {strides = array<i32>} : memref<8x8xf32, #tpu.memory_space<vmem>>, vector<8x8xf32>,
    return
  }
}

</mosaic_0001>

<bundles_post_ra>
// kernel: model_forward.1
= control target key start
LH: loop header
LB: loop body
LE: loop exit
PB: predicated region body
PF: predicated region fallthrough
CT: control target
= control target key end

     0   :  { %16 = vsyncpa [#allocation3], 0  ;;  %s2676_s17 = smov [#allocation2]   ;;  %s3198_s0 = inlined_call_operand.vmem [shape: f32[64,16], index: 0, kind: input, shape index: {}]   ;;  %s3199_s1 = inlined_call_operand.hbm [shape: f32[16,128], index: 1, kind: input, shape index: {}]   ;;  %s3200_s2 = inlined_call_operand.vmem [shape: f32[32,128], index: 2, kind: input, shape index: {}]   ;;  %s3201_s3 = inlined_call_operand.vmem [shape: f32[1,128], index: 3, kind: input, shape index: {}]   ;;  %s3202_s4 = inlined_call_operand.vmem [shape: f32[32,128], index: 4, kind: input, shape index: {}]   ;;  %s3203_s5 = inlined_call_operand.vmem [shape: f32[32,128], index: 5, kind: input, shape index: {}]   ;;  %s3204_s6 = inlined_call_operand.vmem [shape: f32[1,128], index: 6, kind: input, shape index: {}]   ;;  %s3205_s7 = inlined_call_operand.vmem [shape: f32[32,32], index: 7, kind: input, shape index: {}]   ;;  %s3206_s8 = inlined_call_operand.vmem [shape: f32[1,32], index: 8, kind: input, shape index: {}]   ;;  %s3207_s9 = inlined_call_operand.vmem [shape: f32[32,8], index: 9, kind: input, shape index: {}]   ;;  %s3208_s10 = inlined_call_operand.vmem [shape: f32[1,8], index: 10, kind: input, shape index: {}]   ;;  %s3209_s11 = inlined_call_operand.vmem [shape: f32[8,8], index: 11, kind: output, shape index: {}]  }
   0x1   :  { %s24_s18 = sshll.u32 %s2676_s17, 4  ;;  %s25_s18 = int_to_ptr.vmem [resolvable:$true] %s24_s18 }
   0x2   :  { %s2662_s19 = scalar_lea.vmem %s25_s18, 256  ;;  %p2667_p1 = scmp.lt.s32.totalorder %s25_s18, %s25_s18 }
   0x3   :  { %p2663_p0 = scmp.ne.s32.totalorder %s25_s18, %s2662_s19  ;;  %p2668_p2 = scmp.lt.s32.totalorder %s2662_s19, %s2662_s19 }
   0x5   :  { %p2669_p3 = por %p2668_p2, %p2667_p1 }
   0x7   :  { %p2670_p4 = pnand %p2669_p3, %p2663_p0 }
   0x9   :  { %2673 = shalt.err (!%p2670_p4)
}
   0xa   :  { %s2677_s20 = smov 128   ;;  %s2678_s21 = smov 8  }
   0xb   :  { %30 = dma.hbm_to_vmem [thread:$0]  %s3199_s1, 256, %s25_s18, [#allocation3], %s2677_s20, %s2677_s20, %s2678_s21  }
   0xc   :  { %2674 = dma.done.wait [#allocation3], 256  }
   0xd   :  { %2675 = vsyncadd [#allocation3], 4294967040  ;;  %v2679_v0 = vmov 0.0   ;;  %vm2680_vm0 = vmmov 0   ;;  %v61_v1 = vld [vmem:[#allocation2 + $0x8] sm:$0xff]  ;;  %v2752_v2 = vld [vmem:[%s3200_s2 + $0x18] sm:$0xff] }
   0xe   :  { %2293 = vmatprep.subr.mxu1 %v2679_v0  ;;  %2301 = vmatprep.mubr.msk.f32.mxu1 %vm2680_vm0, %v2679_v0  ;;  %v60_v3 = vld [vmem:[#allocation2] sm:$0xff]  ;;  %v2758_v4 = vld [vmem:[%s3200_s2 + $0x10] sm:$0xff]  ;;  %vm73_vm1 = vcmask 130048   ;;  %v53_v6 = vld [vmem:[%s3198_s0 + $0x8] sm:$0xff]  ;;  %s2681_s17 = smov 64   ;;  %vm203_vm2 = vcmask 261120  }
   0xf   :  { %2277 = vmatprep.subr.mxu0 %v61_v1  ;;  %2294 = vmatpush3.msra.mxu1 %v2752_v2  ;;  %v52_v5 = vld [vmem:[%s3198_s0] sm:$0xff]  ;;  %v2771_v7 = vld [vmem:[%s3200_s2 + $0x8] sm:$0xff]  ;;  %v54_v44 = vld [vmem:[%s3198_s0 + $0x10] sm:$0xff]  ;;  %vm2104_vm3 = vcmask 64512  }
  0x10   :  { %2278 = vmatpush3.msra.mxu0 %v61_v1  ;;  %2295 = vmatprep.subr.mxu1 %v2679_v0  ;;  %v2779_v8 = vld [vmem:[%s3200_s2] sm:$0xff]  ;;  %v55_v45 = vld [vmem:[%s3198_s0 + $0x18] sm:$0xff]  ;;  %v57_v47 = vld [vmem:[%s3198_s0 + $0x28] sm:$0xff] }
  0x11   :  { %2279 = vmatprep.subr.mxu0 %v60_v3  ;;  %2296 = vmatpush3.msra.mxu1 %v2758_v4  ;;  %v2808_v10 = vld [vmem:[%s3201_s3] ss:$0 sm:$0xff]  ;;  %s2682_s3 = smov 32   ;;  %v58_v48 = vld [vmem:[%s3198_s0 + $0x30] sm:$0xff]  ;;  %v59_v49 = vld [vmem:[%s3198_s0 + $0x38] sm:$0xff] }
  0x12   :  { %2280 = vmatpush3.msra.mxu0 %v60_v3  ;;  %2281 = vmatprep.mubr.msk.f32.mxu0 %vm73_vm1, %v52_v5  ;;  %v56_v46 = vld [vmem:[%s3198_s0 + $0x20] sm:$0xff] }
  0x13   :  { %2297 = vmatprep.subr.mxu1 %v2679_v0  ;;  %2282 = vmatmul.mubr.msk.f32.vlgmr.msra.gmra.mxu0 %vm73_vm1, %v53_v6 }
  0x14   :  { %2298 = vmatpush3.msra.mxu1 %v2771_v7  ;;  %2315 = vmatprep.subr.mxu0 %v2679_v0 }
  0x15   :  { %2299 = vmatprep.subr.mxu1 %v2679_v0  ;;  %2316 = vmatpush3.msra.mxu0 %v2752_v2 }
  0x16   :  { %2300 = vmatpush3.msra.mxu1 %v2779_v8  ;;  %2317 = vmatprep.subr.mxu0 %v2679_v0 }
  0x17   :  { %2302 = vmatmul.mubr.f32.vlgmr.msra.gmra.mxu1 %v2679_v0  ;;  %2304 = vmatprep.subr.mxu1 %v2679_v0 }
  0x18   :  { %2305 = vmatpush3.msra.mxu1 %v2752_v2  ;;  %2312 = vmatprep.mubr.msk.f32.mxu1 %vm2680_vm0, %v2679_v0 }
  0x19   :  { %2306 = vmatprep.subr.mxu1 %v2679_v0  ;;  %2318 = vmatpush3.msra.mxu0 %v2758_v4 }
  0x1a   :  { %2307 = vmatpush3.msra.mxu1 %v2758_v4  ;;  %2319 = vmatprep.subr.mxu0 %v2679_v0 }
  0x1b   :  { %2308 = vmatprep.subr.mxu1 %v2679_v0  ;;  %2320 = vmatpush3.msra.mxu0 %v2771_v7 }
  0x1c   :  { %2309 = vmatpush3.msra.mxu1 %v2771_v7  ;;  %2321 = vmatprep.subr.mxu0 %v2679_v0 }
  0x1d   :  { %2310 = vmatprep.subr.mxu1 %v2679_v0  ;;  %2322 = vmatpush3.msra.mxu0 %v2779_v8 }
  0x1e   :  { %2311 = vmatpush3.msra.mxu1 %v2779_v8  ;;  %2337 = vmatprep.subr.mxu0 %v2679_v0 }
  0x1f   :  { %2326 = vmatprep.subr.mxu1 %v2679_v0  ;;  %2284 = vmatprep.mubr.msk.f32.mxu0 %vm73_vm1, %v54_v44 }
  0x20   :  { %2285 = vmatmul.mubr.msk.f32.gmra.mxu0 %vm73_vm1, %v55_v45 }
  0x21   :  { %2287 = vmatprep.mubr.msk.f32.mxu0 %vm73_vm1, %v56_v46 }
  0x24   :  { %2288 = vmatmul.mubr.msk.f32.gmra.mxu0 %vm73_vm1, %v57_v47 }
  0x25   :  { %2290 = vmatprep.mubr.msk.f32.mxu0 %vm73_vm1, %v58_v48 }
  0x28   :  { %2291 = vmatmul.mubr.msk.f32.gmra.mxu0 %vm73_vm1, %v59_v49 }
  0x29   :  { %2323 = vmatprep.mubr.msk.f32.mxu0 %vm2680_vm0, %v2679_v0 }
  0xd3   :  { %v2283_v9 = vpop.f32.mrf.mxu0 }
  0xd4   :  { %v170_v30 = vadd.f32 %v2283_v9, %v2808_v10 }
  0xd5   :  { %v164_v11 = vpop.f32.mrf.mxu0 }
  0xd6   :  { %v165_v12 = vadd.f32 %v2808_v10, %v164_v11 }
  0xd7   :  { %v273_v13 = vpop.f32.mrf.mxu1 }
  0xd8   :  { %v277_v14 = vadd.f32 %v273_v13, %v165_v12 }
  0xd9   :  { %v2303_v15 = vpop.f32.mrf.mxu1 }
  0xda   :  { %2518 = vtanh.f32 %v277_v14  ;;  %v2120_v17 = vmul.f32 -1.442695, %v277_v14 }
  0xdc   :  { %2520 = vpow2.f32 %v2120_v17 }
  0xe0   :  { %v2286_v54 = vpop.f32.mrf.mxu0 }
  0xe2   :  { %v174_v55 = vpop.f32.mrf.mxu0 }
  0xe3   :  { %v175_v60 = vadd.f32 %v2808_v10, %v174_v55 }
  0xe4   :  { %v2874_v56 = vpop.f32.mrf.mxu0 }
  0xe6   :  { %v2876_v57 = vpop.f32.mrf.mxu0 }
  0xe7   :  { %v2519_v16 = vpop.eup %2518 }
  0xe8   :  { %287 = vrot.lane.b32.xlu0 %v2519_v16, %s2681_s17  ;;  %v2878_v58 = vpop.f32.mrf.mxu0 }
  0xe9   :  { %v2521_v18 = vpop.eup %2520 }
  0xea   :  { %v281_v19 = vadd.f32 1.0, %v2521_v18  ;;  %v2880_v59 = vpop.f32.mrf.mxu0 }
  0xec   :  { %2522 = vrcp.f32 %v281_v19 }
  0xf9   :  { %v2523_v20 = vpop.eup %2522 }
  0xfa   :  { %v285_v23 = vmul.f32 0.0, %v2523_v20 }
 0x15a   :  { %v288_v21 = vpop.permute.xlu0 %287 }
 0x15b   :  { %v290_v22 = vmul.f32 %v2523_v20, %v288_v21 }
 0x15d   :  { %292 = vrot.lane.b32.xlu0 %v290_v22, %s2682_s3 }
 0x1cf   :  { %v293_v24 = vpop.permute.xlu0 %292 }
 0x1d0   :  { %v295_v25 = vadd.f32 %v293_v24, %v285_v23 }
 0x1d2   :  { %2524 = vtanh.f32 %v295_v25 }
 0x1df   :  { %v2525_v26 = vpop.eup %2524 }
 0x1e0   :  { %298 = vrot.lane.b32.xlu1 %v2525_v26, %s2681_s17 }
 0x252   :  { %v299_v27 = vpop.permute.xlu1 %298 }
 0x253   :  { %v301_v28 = vmul.f32 %v2523_v20, %v299_v27  ;;  %v180_v20 = vadd.f32 %v2286_v54, %v2808_v10 }
 0x255   :  { %303 = vrot.lane.b32.xlu1 %v301_v28, %s2682_s3 }
 0x2c7   :  { %v2815_v29 = vpop.permute.xlu1 %303 }
 0x2c8   :  { %2313 = vmatmul.mubr.msk.f32.vlgmr.msra.gmra.mxu1 %vm203_vm2, %v2815_v29 }
 0x2c9   :  { %2327 = vmatpush3.msra.mxu1 %v2752_v2  ;;  %2334 = vmatprep.mubr.msk.f32.mxu1 %vm2680_vm0, %v2679_v0 }
 0x2ca   :  { %2328 = vmatprep.subr.mxu1 %v2679_v0 }
 0x2cb   :  { %2329 = vmatpush3.msra.mxu1 %v2758_v4 }
 0x2cc   :  { %2330 = vmatprep.subr.mxu1 %v2679_v0 }
 0x2cd   :  { %2331 = vmatpush3.msra.mxu1 %v2771_v7 }
 0x2ce   :  { %2332 = vmatprep.subr.mxu1 %v2679_v0 }
 0x2cf   :  { %2333 = vmatpush3.msra.mxu1 %v2779_v8 }
 0x2d0   :  { %2348 = vmatprep.subr.mxu1 %v2679_v0 }
 0x388   :  { %v373_v31 = vpop.f32.mrf.mxu1 }
 0x389   :  { %v377_v32 = vadd.f32 %v373_v31, %v170_v30 }
 0x38a   :  { %v2314_v33 = vpop.f32.mrf.mxu1 }
 0x38b   :  { %2526 = vtanh.f32 %v377_v32  ;;  %v2122_v35 = vmul.f32 -1.442695, %v377_v32 }
 0x38d   :  { %2528 = vpow2.f32 %v2122_v35 }
 0x398   :  { %v2527_v34 = vpop.eup %2526 }
 0x399   :  { %387 = vrot.lane.b32.xlu0 %v2527_v34, %s2681_s17 }
 0x39a   :  { %v2529_v36 = vpop.eup %2528 }
 0x39b   :  { %v381_v37 = vadd.f32 1.0, %v2529_v36 }
 0x39d   :  { %2530 = vrcp.f32 %v381_v37 }
 0x3aa   :  { %v2531_v38 = vpop.eup %2530 }
 0x3ab   :  { %v385_v41 = vmul.f32 %v2531_v38, %v295_v25 }
 0x40b   :  { %v388_v39 = vpop.permute.xlu0 %387 }
 0x40c   :  { %v390_v40 = vmul.f32 %v2531_v38, %v388_v39  ;;  %v185_v39 = vadd.f32 %v2808_v10, %v2876_v57 }
 0x40e   :  { %392 = vrot.lane.b32.xlu1 %v390_v40, %s2682_s3 }
 0x480   :  { %v393_v42 = vpop.permute.xlu1 %392 }
 0x481   :  { %v395_v43 = vadd.f32 %v393_v42, %v385_v41 }
 0x483   :  { %2532 = vtanh.f32 %v395_v43 }
 0x490   :  { %v2533_v50 = vpop.eup %2532 }
 0x491   :  { %398 = vrot.lane.b32.xlu0 %v2533_v50, %s2681_s17 }
 0x503   :  { %v399_v51 = vpop.permute.xlu0 %398 }
 0x504   :  { %v401_v52 = vmul.f32 %v2531_v38, %v399_v51 }
 0x506   :  { %403 = vrot.lane.b32.xlu1 %v401_v52, %s2682_s3 }
 0x578   :  { %v2860_v53 = vpop.permute.xlu1 %403 }
 0x579   :  { %2324 = vmatmul.mubr.msk.f32.vlgmr.msra.gmra.mxu0 %vm203_vm2, %v2860_v53 }
 0x57a   :  { %2338 = vmatpush3.msra.mxu0 %v2752_v2  ;;  %2345 = vmatprep.mubr.msk.f32.mxu0 %vm2680_vm0, %v2679_v0 }
 0x57b   :  { %2339 = vmatprep.subr.mxu0 %v2679_v0 }
 0x57c   :  { %2340 = vmatpush3.msra.mxu0 %v2758_v4 }
 0x57d   :  { %2341 = vmatprep.subr.mxu0 %v2679_v0 }
 0x57e   :  { %2342 = vmatpush3.msra.mxu0 %v2771_v7 }
 0x57f   :  { %2343 = vmatprep.subr.mxu0 %v2679_v0 }
 0x580   :  { %2344 = vmatpush3.msra.mxu0 %v2779_v8 }
 0x581   :  { %2359 = vmatprep.subr.mxu0 %v2679_v0 }
 0x639   :  { %v473_v61 = vpop.f32.mrf.mxu0 }
 0x63a   :  { %v477_v62 = vadd.f32 %v473_v61, %v175_v60 }
 0x63b   :  { %v2325_v63 = vpop.f32.mrf.mxu0 }
 0x63c   :  { %2534 = vtanh.f32 %v477_v62  ;;  %v2124_v3 = vmul.f32 -1.442695, %v477_v62 }
 0x63e   :  { %2536 = vpow2.f32 %v2124_v3 }
 0x649   :  { %v2535_v1 = vpop.eup %2534 }
 0x64a   :  { %487 = vrot.lane.b32.xlu0 %v2535_v1, %s2681_s17 }
 0x64b   :  { %v2537_v5 = vpop.eup %2536 }
 0x64c   :  { %v481_v6 = vadd.f32 1.0, %v2537_v5 }
 0x64e   :  { %2538 = vrcp.f32 %v481_v6 }
 0x65b   :  { %v2539_v9 = vpop.eup %2538 }
 0x65c   :  { %v485_v13 = vmul.f32 %v2539_v9, %v395_v43 }
 0x6bc   :  { %v488_v11 = vpop.permute.xlu0 %487 }
 0x6bd   :  { %v490_v12 = vmul.f32 %v2539_v9, %v488_v11 }
 0x6bf   :  { %492 = vrot.lane.b32.xlu1 %v490_v12, %s2682_s3  ;;  %v1005_v12 = vld [vmem:[%s3202_s4 + $0x18] sm:$0xff] }
 0x731   :  { %v493_v14 = vpop.permute.xlu1 %492 }
 0x732   :  { %v495_v15 = vadd.f32 %v493_v14, %v485_v13 }
 0x734   :  { %2540 = vtanh.f32 %v495_v15 }
 0x741   :  { %v2541_v16 = vpop.eup %2540 }
 0x742   :  { %498 = vrot.lane.b32.xlu0 %v2541_v16, %s2681_s17 }
 0x7b4   :  { %v499_v17 = vpop.permute.xlu0 %498 }
 0x7b5   :  { %v501_v18 = vmul.f32 %v2539_v9, %v499_v17  ;;  %v1004_v17 = vld [vmem:[%s3202_s4 + $0x10] sm:$0xff] }
 0x7b7   :  { %503 = vrot.lane.b32.xlu1 %v501_v18, %s2682_s3  ;;  %v1003_v18 = vld [vmem:[%s3202_s4 + $0x8] sm:$0xff] }
 0x829   :  { %v2887_v19 = vpop.permute.xlu1 %503 }
 0x82a   :  { %2335 = vmatmul.mubr.msk.f32.vlgmr.msra.gmra.mxu1 %vm203_vm2, %v2887_v19 }
 0x82b   :  { %2349 = vmatpush3.msra.mxu1 %v2752_v2  ;;  %2356 = vmatprep.mubr.msk.f32.mxu1 %vm2680_vm0, %v2679_v0 }
 0x82c   :  { %2350 = vmatprep.subr.mxu1 %v2679_v0 }
 0x82d   :  { %2351 = vmatpush3.msra.mxu1 %v2758_v4 }
 0x82e   :  { %2352 = vmatprep.subr.mxu1 %v2679_v0 }
 0x82f   :  { %2353 = vmatpush3.msra.mxu1 %v2771_v7 }
 0x830   :  { %2354 = vmatprep.subr.mxu1 %v2679_v0 }
 0x831   :  { %2355 = vmatpush3.msra.mxu1 %v2779_v8 }
 0x832   :  { %2370 = vmatprep.subr.mxu1 %v2679_v0 }
 0x8ea   :  { %v573_v21 = vpop.f32.mrf.mxu1 }
 0x8eb   :  { %v577_v22 = vadd.f32 %v573_v21, %v180_v20  ;;  %v1002_v20 = vld [vmem:[%s3202_s4] sm:$0xff] }
 0x8ec   :  { %v2336_v23 = vpop.f32.mrf.mxu1 }
 0x8ed   :  { %2542 = vtanh.f32 %v577_v22  ;;  %v2126_v25 = vmul.f32 -1.442695, %v577_v22 }
 0x8ef   :  { %2544 = vpow2.f32 %v2126_v25 }
 0x8fa   :  { %v2543_v24 = vpop.eup %2542 }
 0x8fb   :  { %587 = vrot.lane.b32.xlu0 %v2543_v24, %s2681_s17 }
 0x8fc   :  { %v2545_v26 = vpop.eup %2544 }
 0x8fd   :  { %v581_v27 = vadd.f32 1.0, %v2545_v26 }
 0x8ff   :  { %2546 = vrcp.f32 %v581_v27 }
 0x90c   :  { %v2547_v28 = vpop.eup %2546 }
 0x90d   :  { %v585_v32 = vmul.f32 %v2547_v28, %v495_v15 }
 0x96d   :  { %v588_v30 = vpop.permute.xlu0 %587 }
 0x96e   :  { %v590_v31 = vmul.f32 %v2547_v28, %v588_v30 }
 0x970   :  { %592 = vrot.lane.b32.xlu1 %v590_v31, %s2682_s3 }
 0x9e2   :  { %v593_v33 = vpop.permute.xlu1 %592 }
 0x9e3   :  { %v595_v34 = vadd.f32 %v593_v33, %v585_v32  ;;  %v2977_v33 = vld [vmem:[%s3203_s5 + $0x18] sm:$0xff] }
 0x9e5   :  { %2548 = vtanh.f32 %v595_v34 }
 0x9f2   :  { %v2549_v35 = vpop.eup %2548 }
 0x9f3   :  { %598 = vrot.lane.b32.xlu0 %v2549_v35, %s2681_s17  ;;  %v2990_v35 = vld [vmem:[%s3203_s5 + $0x8] sm:$0xff] }
 0xa65   :  { %v599_v36 = vpop.permute.xlu0 %598 }
 0xa66   :  { %v601_v37 = vmul.f32 %v2547_v28, %v599_v36  ;;  %v2997_v36 = vld [vmem:[%s3203_s5] sm:$0xff] }
 0xa68   :  { %603 = vrot.lane.b32.xlu1 %v601_v37, %s2682_s3 }
 0xada   :  { %v2906_v38 = vpop.permute.xlu1 %603 }
 0xadb   :  { %2346 = vmatmul.mubr.msk.f32.vlgmr.msra.gmra.mxu0 %vm203_vm2, %v2906_v38 }
 0xadc   :  { %2360 = vmatpush3.msra.mxu0 %v2752_v2  ;;  %2367 = vmatprep.mubr.msk.f32.mxu0 %vm2680_vm0, %v2679_v0 }
 0xadd   :  { %2361 = vmatprep.subr.mxu0 %v2679_v0 }
 0xade   :  { %2362 = vmatpush3.msra.mxu0 %v2758_v4 }
 0xadf   :  { %2363 = vmatprep.subr.mxu0 %v2679_v0 }
 0xae0   :  { %2364 = vmatpush3.msra.mxu0 %v2771_v7 }
 0xae1   :  { %2365 = vmatprep.subr.mxu0 %v2679_v0 }
 0xae2   :  { %2366 = vmatpush3.msra.mxu0 %v2779_v8 }
 0xae3   :  { %2381 = vmatprep.subr.mxu0 %v1005_v12 }
 0xb9b   :  { %v673_v40 = vpop.f32.mrf.mxu0 }
 0xb9c   :  { %v677_v41 = vadd.f32 %v673_v40, %v185_v39  ;;  %v200_v40 = vadd.f32 %v2878_v58, %v2808_v10 }
 0xb9d   :  { %v2347_v42 = vpop.f32.mrf.mxu0 }
 0xb9e   :  { %2550 = vtanh.f32 %v677_v41  ;;  %v2128_v44 = vmul.f32 -1.442695, %v677_v41 }
 0xba0   :  { %2552 = vpow2.f32 %v2128_v44 }
 0xbab   :  { %v2551_v43 = vpop.eup %2550 }
 0xbac   :  { %687 = vrot.lane.b32.xlu0 %v2551_v43, %s2681_s17 }
 0xbad   :  { %v2553_v45 = vpop.eup %2552 }
 0xbae   :  { %v681_v46 = vadd.f32 1.0, %v2553_v45 }
 0xbb0   :  { %2554 = vrcp.f32 %v681_v46  ;;  %v3033_v46 = vld [vmem:[%s3204_s6] ss:$0 sm:$0xff] }
 0xbbd   :  { %v2555_v47 = vpop.eup %2554 }
 0xbbe   :  { %v685_v50 = vmul.f32 %v2555_v47, %v595_v34  ;;  %v2983_v34 = vld [vmem:[%s3203_s5 + $0x10] sm:$0xff] }
 0xc1e   :  { %v688_v48 = vpop.permute.xlu0 %687 }
 0xc1f   :  { %v690_v49 = vmul.f32 %v2555_v47, %v688_v48 }
 0xc21   :  { %692 = vrot.lane.b32.xlu1 %v690_v49, %s2682_s3 }
 0xc93   :  { %v693_v51 = vpop.permute.xlu1 %692 }
 0xc94   :  { %v695_v52 = vadd.f32 %v693_v51, %v685_v50 }
 0xc96   :  { %2556 = vtanh.f32 %v695_v52 }
 0xca3   :  { %v2557_v54 = vpop.eup %2556 }
 0xca4   :  { %698 = vrot.lane.b32.xlu0 %v2557_v54, %s2681_s17 }
 0xd16   :  { %v699_v55 = vpop.permute.xlu0 %698 }
 0xd17   :  { %v701_v57 = vmul.f32 %v2555_v47, %v699_v55 }
 0xd19   :  { %703 = vrot.lane.b32.xlu1 %v701_v57, %s2682_s3 }
 0xd8b   :  { %v704_v60 = vpop.permute.xlu1 %703 }
 0xd8c   :  { %2357 = vmatmul.mubr.msk.f32.vlgmr.msra.gmra.mxu1 %vm203_vm2, %v704_v60 }
 0xd8d   :  { %2371 = vmatpush3.msra.mxu1 %v2752_v2  ;;  %2378 = vmatprep.mubr.msk.f32.mxu1 %vm2680_vm0, %v2679_v0  ;;  %v190_v2 = vadd.f32 %v2874_v56, %v2808_v10 }
 0xd8e   :  { %2372 = vmatprep.subr.mxu1 %v2679_v0 }
 0xd8f   :  { %2373 = vmatpush3.msra.mxu1 %v2758_v4 }
 0xd90   :  { %2374 = vmatprep.subr.mxu1 %v2679_v0 }
 0xd91   :  { %2375 = vmatpush3.msra.mxu1 %v2771_v7 }
 0xd92   :  { %2376 = vmatprep.subr.mxu1 %v2679_v0 }
 0xd93   :  { %2377 = vmatpush3.msra.mxu1 %v2779_v8 }
 0xd94   :  { %2401 = vmatprep.subr.mxu1 %v2679_v0 }
 0xe4c   :  { %v773_v61 = vpop.f32.mrf.mxu1 }
 0xe4d   :  { %v777_v62 = vadd.f32 %v773_v61, %v190_v2 }
 0xe4e   :  { %v2358_v63 = vpop.f32.mrf.mxu1 }
 0xe4f   :  { %2558 = vtanh.f32 %v777_v62  ;;  %v2130_v4 = vmul.f32 -1.442695, %v777_v62 }
 0xe51   :  { %2560 = vpow2.f32 %v2130_v4 }
 0xe5c   :  { %v2559_v1 = vpop.eup %2558 }
 0xe5d   :  { %787 = vrot.lane.b32.xlu0 %v2559_v1, %s2681_s17 }
 0xe5e   :  { %v2561_v3 = vpop.eup %2560 }
 0xe5f   :  { %v781_v7 = vadd.f32 1.0, %v2561_v3 }
 0xe61   :  { %2562 = vrcp.f32 %v781_v7 }
 0xe6e   :  { %v2563_v5 = vpop.eup %2562 }
 0xe6f   :  { %v785_v9 = vmul.f32 %v2563_v5, %v695_v52 }
 0xecf   :  { %v788_v6 = vpop.permute.xlu0 %787 }
 0xed0   :  { %v790_v8 = vmul.f32 %v2563_v5, %v788_v6 }
 0xed2   :  { %792 = vrot.lane.b32.xlu1 %v790_v8, %s2682_s3 }
 0xf44   :  { %v793_v11 = vpop.permute.xlu1 %792 }
 0xf45   :  { %v795_v56 = vadd.f32 %v793_v11, %v785_v9 }
 0xf47   :  { %2564 = vtanh.f32 %v795_v56 }
 0xf54   :  { %v2565_v13 = vpop.eup %2564 }
 0xf55   :  { %798 = vrot.lane.b32.xlu0 %v2565_v13, %s2681_s17 }
 0xfc7   :  { %v799_v14 = vpop.permute.xlu0 %798 }
 0xfc8   :  { %v801_v15 = vmul.f32 %v2563_v5, %v799_v14 }
 0xfca   :  { %803 = vrot.lane.b32.xlu1 %v801_v15, %s2682_s3 }
0x103c   :  { %v804_v16 = vpop.permute.xlu1 %803 }
0x103d   :  { %2368 = vmatmul.mubr.msk.f32.vlgmr.msra.gmra.mxu0 %vm203_vm2, %v804_v16 }
0x103e   :  { %2382 = vmatpush3.msra.mxu0 %v1005_v12  ;;  %2389 = vmatprep.mubr.msk.f32.mxu0 %vm203_vm2, %v2815_v29  ;;  %v195_v29 = vadd.f32 %v2808_v10, %v2880_v59 }
0x103f   :  { %2383 = vmatprep.subr.mxu0 %v1004_v17 }
0x1040   :  { %2384 = vmatpush3.msra.mxu0 %v1004_v17 }
0x1041   :  { %2385 = vmatprep.subr.mxu0 %v1003_v18 }
0x1042   :  { %2386 = vmatpush3.msra.mxu0 %v1003_v18 }
0x1043   :  { %2387 = vmatprep.subr.mxu0 %v1002_v20 }
0x1044   :  { %2388 = vmatpush3.msra.mxu0 %v1002_v20 }
0x1045   :  { %2390 = vmatmul.mubr.msk.f32.vlgmr.msra.gmra.mxu0 %vm203_vm2, %v2860_v53  ;;  %2423 = vmatprep.subr.mxu0 %v2679_v0 }
0x1046   :  { %2392 = vmatprep.mubr.msk.f32.mxu0 %vm203_vm2, %v2887_v19  ;;  %2424 = vmatpush3.msra.mxu0 %v2977_v33 }
0x1047   :  { %2425 = vmatprep.subr.mxu0 %v2679_v0 }
0x1048   :  { %2426 = vmatpush3.msra.mxu0 %v2983_v34 }
0x1049   :  { %2393 = vmatmul.mubr.msk.f32.gmra.mxu0 %vm203_vm2, %v2906_v38  ;;  %2427 = vmatprep.subr.mxu0 %v2679_v0 }
0x104a   :  { %2395 = vmatprep.mubr.msk.f32.mxu0 %vm203_vm2, %v704_v60  ;;  %2428 = vmatpush3.msra.mxu0 %v2990_v35 }
0x104b   :  { %2429 = vmatprep.subr.mxu0 %v2679_v0 }
0x104c   :  { %2430 = vmatpush3.msra.mxu0 %v2997_v36 }
0x104d   :  { %2396 = vmatmul.mubr.msk.f32.gmra.mxu0 %vm203_vm2, %v804_v16  ;;  %2445 = vmatprep.subr.mxu0 %v2679_v0 }
0x10fd   :  { %v873_v21 = vpop.f32.mrf.mxu0 }
0x10fe   :  { %v877_v22 = vadd.f32 %v873_v21, %v195_v29 }
0x10ff   :  { %v2369_v23 = vpop.f32.mrf.mxu0 }
0x1100   :  { %2566 = vtanh.f32 %v877_v22  ;;  %v2132_v24 = vmul.f32 -1.442695, %v877_v22 }
0x1102   :  { %2568 = vpow2.f32 %v2132_v24 }
0x1105   :  { %v3028_v41 = vpop.f32.mrf.mxu0 }
0x1106   :  { %v1094_v17 = vadd.f32 %v3028_v41, %v3033_v46 }
0x1107   :  { %v1088_v45 = vpop.f32.mrf.mxu0 }
0x1108   :  { %v1089_v47 = vadd.f32 %v3033_v46, %v1088_v45 }
0x110d   :  { %v2567_v53 = vpop.eup %2566 }
0x110e   :  { %887 = vrot.lane.b32.xlu0 %v2567_v53, %s2681_s17 }
0x110f   :  { %v2569_v19 = vpop.eup %2568 }
0x1110   :  { %v881_v25 = vadd.f32 1.0, %v2569_v19 }
0x1112   :  { %2570 = vrcp.f32 %v881_v25 }
0x111f   :  { %v2571_v26 = vpop.eup %2570 }
0x1120   :  { %v885_v30 = vmul.f32 %v2571_v26, %v795_v56 }
0x1180   :  { %v888_v27 = vpop.permute.xlu0 %887 }
0x1181   :  { %v890_v28 = vmul.f32 %v2571_v26, %v888_v27 }
0x1183   :  { %892 = vrot.lane.b32.xlu1 %v890_v28, %s2682_s3 }
0x11f5   :  { %v893_v31 = vpop.permute.xlu1 %892 }
0x11f6   :  { %v2970_v59 = vadd.f32 %v893_v31, %v885_v30 }
0x11f8   :  { %2572 = vtanh.f32 %v2970_v59 }
0x1205   :  { %v2573_v32 = vpop.eup %2572 }
0x1206   :  { %898 = vrot.lane.b32.xlu0 %v2573_v32, %s2681_s17 }
0x1278   :  { %v899_v37 = vpop.permute.xlu0 %898 }
0x1279   :  { %v901_v38 = vmul.f32 %v2571_v26, %v899_v37 }
0x127b   :  { %903 = vrot.lane.b32.xlu1 %v901_v38, %s2682_s3  ;;  %v2394_v38 = vpop.f32.mrf.mxu0 }
0x12ed   :  { %v904_v39 = vpop.permute.xlu1 %903 }
0x12ee   :  { %2379 = vmatmul.mubr.msk.f32.vlgmr.msra.gmra.mxu1 %vm203_vm2, %v904_v39  ;;  %2398 = vmatprep.mubr.msk.f32.mxu0 %vm203_vm2, %v904_v39  ;;  %v1098_v39 = vpop.f32.mrf.mxu0 }
0x12ef   :  { %2402 = vmatpush3.msra.mxu1 %v2977_v33  ;;  %2409 = vmatprep.mubr.msk.f32.mxu1 %vm2680_vm0, %v2679_v0 }
0x12f0   :  { %2403 = vmatprep.subr.mxu1 %v2679_v0 }
0x12f1   :  { %2404 = vmatpush3.msra.mxu1 %v2983_v34 }
0x12f2   :  { %2405 = vmatprep.subr.mxu1 %v2679_v0 }
0x12f3   :  { %2406 = vmatpush3.msra.mxu1 %v2990_v35 }
0x12f4   :  { %2407 = vmatprep.subr.mxu1 %v2679_v0 }
0x12f5   :  { %2408 = vmatpush3.msra.mxu1 %v2997_v36 }
0x12f6   :  { %2410 = vmatmul.mubr.f32.vlgmr.msra.gmra.mxu1 %v2679_v0  ;;  %2412 = vmatprep.subr.mxu1 %v2679_v0 }
0x12f7   :  { %2413 = vmatpush3.msra.mxu1 %v2977_v33  ;;  %2420 = vmatprep.mubr.msk.f32.mxu1 %vm2680_vm0, %v2679_v0 }
0x12f8   :  { %2414 = vmatprep.subr.mxu1 %v2679_v0 }
0x12f9   :  { %2415 = vmatpush3.msra.mxu1 %v2983_v34 }
0x12fa   :  { %2416 = vmatprep.subr.mxu1 %v2679_v0 }
0x12fb   :  { %2417 = vmatpush3.msra.mxu1 %v2990_v35 }
0x12fc   :  { %2418 = vmatprep.subr.mxu1 %v2679_v0 }
0x12fd   :  { %2419 = vmatpush3.msra.mxu1 %v2997_v36 }
0x12fe   :  { %2434 = vmatprep.subr.mxu1 %v2679_v0 }
0x13ae   :  { %v973_v42 = vpop.f32.mrf.mxu1 }
0x13af   :  { %v977_v43 = vadd.f32 %v973_v42, %v200_v40  ;;  %v3076_v40 = vpop.f32.mrf.mxu0 }
0x13b0   :  { %v2380_v44 = vpop.f32.mrf.mxu1 }
0x13b1   :  { %v2134_v1 = vmul.f32 -1.442695, %v977_v43  ;;  %v3078_v41 = vpop.f32.mrf.mxu0  ;;  %v1099_v44 = vadd.f32 %v3033_v46, %v1098_v39 }
0x13b6   :  { %v1193_v48 = vpop.f32.mrf.mxu1 }
0x13b7   :  { %v1197_v49 = vadd.f32 %v1193_v48, %v1089_v47 }
0x13b8   :  { %v2411_v50 = vpop.f32.mrf.mxu1 }
0x13b9   :  { %2574 = vtanh.f32 %v1197_v49  ;;  %v2144_v10 = vmul.f32 -1.442695, %v1197_v49 }
0x13bb   :  { %2576 = vpow2.f32 %v2144_v10 }
0x13c6   :  { %v2575_v51 = vpop.eup %2574 }
0x13c7   :  { %1207 = vrot.lane.b32.xlu0 %v2575_v51, %s2681_s17 }
0x13c8   :  { %v2577_v58 = vpop.eup %2576 }
0x13c9   :  { %v1201_v52 = vadd.f32 1.0, %v2577_v58 }
0x13cb   :  { %2578 = vrcp.f32 %v1201_v52 }
0x13d8   :  { %v2579_v54 = vpop.eup %2578 }
0x13d9   :  { %v1205_v60 = vmul.f32 0.0, %v2579_v54 }
0x1439   :  { %v1208_v55 = vpop.permute.xlu0 %1207 }
0x143a   :  { %v1210_v57 = vmul.f32 %v2579_v54, %v1208_v55 }
0x143c   :  { %1212 = vrot.lane.b32.xlu1 %v1210_v57, %s2682_s3 }
0x14ae   :  { %v1213_v2 = vpop.permute.xlu1 %1212 }
0x14af   :  { %v1215_v61 = vadd.f32 %v1213_v2, %v1205_v60 }
0x14b1   :  { %2580 = vtanh.f32 %v1215_v61 }
0x14b2   :  { %2582 = vtanh.f32 %v977_v43 }
0x14b3   :  { %2584 = vpow2.f32 %v2134_v1  ;;  %v1104_v1 = vadd.f32 %v2394_v38, %v3033_v46 }
0x14be   :  { %v2581_v62 = vpop.eup %2580 }
0x14bf   :  { %1218 = vrot.lane.b32.xlu0 %v2581_v62, %s2681_s17  ;;  %v2583_v63 = vpop.eup %2582 }
0x14c0   :  { %v2585_v4 = vpop.eup %2584 }
0x14c1   :  { %v981_v3 = vadd.f32 1.0, %v2585_v4 }
0x14c3   :  { %987 = vrot.lane.b32.xlu0 %v2583_v63, %s2681_s17  ;;  %2586 = vrcp.f32 %v981_v3 }
0x14d0   :  { %v2587_v6 = vpop.eup %2586 }
0x14d1   :  { %v985_v56 = vmul.f32 %v2587_v6, %v2970_v59 }
0x1531   :  { %v1219_v7 = vpop.permute.xlu0 %1218 }
0x1532   :  { %v1221_v5 = vmul.f32 %v2579_v54, %v1219_v7 }
0x1534   :  { %1223 = vrot.lane.b32.xlu1 %v1221_v5, %s2682_s3 }
0x1535   :  { %v988_v8 = vpop.permute.xlu0 %987 }
0x1536   :  { %v990_v9 = vmul.f32 %v2587_v6, %v988_v8 }
0x1538   :  { %992 = vrot.lane.b32.xlu0 %v990_v9, %s2682_s3 }
0x15a6   :  { %v1224_v11 = vpop.permute.xlu1 %1223 }
0x15a7   :  { %2421 = vmatmul.mubr.msk.f32.vlgmr.msra.gmra.mxu1 %vm203_vm2, %v1224_v11 }
0x15a8   :  { %2435 = vmatpush3.msra.mxu1 %v2977_v33  ;;  %2442 = vmatprep.mubr.msk.f32.mxu1 %vm2680_vm0, %v2679_v0 }
0x15a9   :  { %2436 = vmatprep.subr.mxu1 %v2679_v0 }
0x15aa   :  { %v993_v12 = vpop.permute.xlu0 %992  ;;  %2437 = vmatpush3.msra.mxu1 %v2983_v34 }
0x15ab   :  { %v995_v13 = vadd.f32 %v993_v12, %v985_v56  ;;  %2438 = vmatprep.subr.mxu1 %v2679_v0 }
0x15ac   :  { %2439 = vmatpush3.msra.mxu1 %v2990_v35 }
0x15ad   :  { %2588 = vtanh.f32 %v995_v13  ;;  %2440 = vmatprep.subr.mxu1 %v2679_v0 }
0x15ae   :  { %2441 = vmatpush3.msra.mxu1 %v2997_v36 }
0x15af   :  { %2456 = vmatprep.subr.mxu1 %v2679_v0 }
0x15ba   :  { %v2589_v14 = vpop.eup %2588 }
0x15bb   :  { %998 = vrot.lane.b32.xlu0 %v2589_v14, %s2681_s17 }
0x162d   :  { %v999_v15 = vpop.permute.xlu0 %998 }
0x162e   :  { %v1001_v16 = vmul.f32 %v2587_v6, %v999_v15 }
0x1630   :  { %1018 = vrot.lane.b32.xlu0 %v1001_v16, %s2682_s3 }
0x1667   :  { %v1293_v18 = vpop.f32.mrf.mxu1 }
0x1668   :  { %v1297_v20 = vadd.f32 %v1293_v18, %v1094_v17 }
0x1669   :  { %v2422_v29 = vpop.f32.mrf.mxu1 }
0x166a   :  { %2590 = vtanh.f32 %v1297_v20  ;;  %v2146_v23 = vmul.f32 -1.442695, %v1297_v20  ;;  %v1109_v29 = vadd.f32 %v3033_v46, %v3078_v41 }
0x166c   :  { %2592 = vpow2.f32 %v2146_v23 }
0x1677   :  { %v2591_v21 = vpop.eup %2590 }
0x1678   :  { %1307 = vrot.lane.b32.xlu1 %v2591_v21, %s2681_s17 }
0x1679   :  { %v2593_v53 = vpop.eup %2592 }
0x167a   :  { %v1301_v24 = vadd.f32 1.0, %v2593_v53 }
0x167c   :  { %2594 = vrcp.f32 %v1301_v24 }
0x1689   :  { %v2595_v19 = vpop.eup %2594 }
0x168a   :  { %v1305_v27 = vmul.f32 %v2595_v19, %v1215_v61 }
0x16a2   :  { %v1019_v22 = vpop.permute.xlu0 %1018 }
0x16a3   :  { %2399 = vmatmul.mubr.msk.f32.gmra.mxu0 %vm203_vm2, %v1019_v22 }
0x16a4   :  { %2431 = vmatprep.mubr.msk.f32.mxu0 %vm2680_vm0, %v2679_v0 }
0x16ea   :  { %v1308_v25 = vpop.permute.xlu1 %1307 }
0x16eb   :  { %v1310_v26 = vmul.f32 %v2595_v19, %v1308_v25 }
0x16ed   :  { %1312 = vrot.lane.b32.xlu1 %v1310_v26, %s2682_s3 }
0x175f   :  { %v1313_v28 = vpop.permute.xlu1 %1312 }
0x1760   :  { %v1315_v30 = vadd.f32 %v1313_v28, %v1305_v27 }
0x1762   :  { %2596 = vtanh.f32 %v1315_v30 }
0x1763   :  { %v3080_v42 = vpop.f32.mrf.mxu0 }
0x1765   :  { %v3082_v43 = vpop.f32.mrf.mxu0 }
0x176f   :  { %v2597_v31 = vpop.eup %2596 }
0x1770   :  { %1318 = vrot.lane.b32.xlu1 %v2597_v31, %s2681_s17 }
0x17e2   :  { %v1319_v59 = vpop.permute.xlu1 %1318 }
0x17e3   :  { %v1321_v32 = vmul.f32 %v2595_v19, %v1319_v59 }
0x17e5   :  { %1323 = vrot.lane.b32.xlu1 %v1321_v32, %s2682_s3 }
0x1857   :  { %v1324_v37 = vpop.permute.xlu1 %1323 }
0x1858   :  { %2432 = vmatmul.mubr.msk.f32.vlgmr.msra.gmra.mxu0 %vm203_vm2, %v1324_v37 }
0x1859   :  { %2446 = vmatpush3.msra.mxu0 %v2977_v33  ;;  %2453 = vmatprep.mubr.msk.f32.mxu0 %vm2680_vm0, %v2679_v0 }
0x185a   :  { %2447 = vmatprep.subr.mxu0 %v2679_v0 }
0x185b   :  { %2448 = vmatpush3.msra.mxu0 %v2983_v34 }
0x185c   :  { %2449 = vmatprep.subr.mxu0 %v2679_v0 }
0x185d   :  { %2450 = vmatpush3.msra.mxu0 %v2990_v35 }
0x185e   :  { %2451 = vmatprep.subr.mxu0 %v2679_v0 }
0x185f   :  { %2452 = vmatpush3.msra.mxu0 %v2997_v36 }
0x1860   :  { %2467 = vmatprep.subr.mxu0 %v2679_v0 }
0x1918   :  { %v1393_v45 = vpop.f32.mrf.mxu0 }
0x1919   :  { %v1397_v47 = vadd.f32 %v1393_v45, %v1099_v44 }
0x191a   :  { %v2433_v48 = vpop.f32.mrf.mxu0 }
0x191b   :  { %2598 = vtanh.f32 %v1397_v47  ;;  %v2148_v50 = vmul.f32 -1.442695, %v1397_v47 }
0x191d   :  { %2600 = vpow2.f32 %v2148_v50 }
0x1928   :  { %v2599_v49 = vpop.eup %2598 }
0x1929   :  { %1407 = vrot.lane.b32.xlu0 %v2599_v49, %s2681_s17 }
0x192a   :  { %v2601_v51 = vpop.eup %2600 }
0x192b   :  { %v1401_v10 = vadd.f32 1.0, %v2601_v51 }
0x192d   :  { %2602 = vrcp.f32 %v1401_v10 }
0x193a   :  { %v2603_v58 = vpop.eup %2602 }
0x193b   :  { %v1405_v55 = vmul.f32 %v2603_v58, %v1315_v30 }
0x199b   :  { %v1408_v52 = vpop.permute.xlu0 %1407 }
0x199c   :  { %v1410_v54 = vmul.f32 %v2603_v58, %v1408_v52 }
0x199e   :  { %1412 = vrot.lane.b32.xlu1 %v1410_v54, %s2682_s3 }
0x1a10   :  { %v1413_v57 = vpop.permute.xlu1 %1412 }
0x1a11   :  { %v1415_v60 = vadd.f32 %v1413_v57, %v1405_v55  ;;  %v1119_v57 = vadd.f32 %v3033_v46, %v3082_v43 }
0x1a13   :  { %2604 = vtanh.f32 %v1415_v60 }
0x1a20   :  { %v2605_v2 = vpop.eup %2604 }
0x1a21   :  { %1418 = vrot.lane.b32.xlu0 %v2605_v2, %s2681_s17 }
0x1a93   :  { %v1419_v61 = vpop.permute.xlu0 %1418 }
0x1a94   :  { %v1421_v62 = vmul.f32 %v2603_v58, %v1419_v61 }
0x1a96   :  { %1423 = vrot.lane.b32.xlu1 %v1421_v62, %s2682_s3 }
0x1b08   :  { %v1424_v63 = vpop.permute.xlu1 %1423 }
0x1b09   :  { %2443 = vmatmul.mubr.msk.f32.vlgmr.msra.gmra.mxu1 %vm203_vm2, %v1424_v63 }
0x1b0a   :  { %2457 = vmatpush3.msra.mxu1 %v2977_v33  ;;  %2464 = vmatprep.mubr.msk.f32.mxu1 %vm2680_vm0, %v2679_v0 }
0x1b0b   :  { %2458 = vmatprep.subr.mxu1 %v2679_v0 }
0x1b0c   :  { %2459 = vmatpush3.msra.mxu1 %v2983_v34 }
0x1b0d   :  { %2460 = vmatprep.subr.mxu1 %v2679_v0 }
0x1b0e   :  { %2461 = vmatpush3.msra.mxu1 %v2990_v35 }
0x1b0f   :  { %2462 = vmatprep.subr.mxu1 %v2679_v0 }
0x1b10   :  { %2463 = vmatpush3.msra.mxu1 %v2997_v36 }
0x1b11   :  { %2478 = vmatprep.subr.mxu1 %v2679_v0 }
0x1bc9   :  { %v1493_v4 = vpop.f32.mrf.mxu1 }
0x1bca   :  { %v1497_v3 = vadd.f32 %v1493_v4, %v1104_v1 }
0x1bcb   :  { %v2444_v7 = vpop.f32.mrf.mxu1 }
0x1bcc   :  { %2606 = vtanh.f32 %v1497_v3  ;;  %v2150_v6 = vmul.f32 -1.442695, %v1497_v3 }
0x1bce   :  { %2608 = vpow2.f32 %v2150_v6 }
0x1bd9   :  { %v2607_v5 = vpop.eup %2606 }
0x1bda   :  { %1507 = vrot.lane.b32.xlu0 %v2607_v5, %s2681_s17 }
0x1bdb   :  { %v2609_v8 = vpop.eup %2608 }
0x1bdc   :  { %v1501_v9 = vadd.f32 1.0, %v2609_v8 }
0x1bde   :  { %2610 = vrcp.f32 %v1501_v9 }
0x1beb   :  { %v2611_v11 = vpop.eup %2610 }
0x1bec   :  { %v1505_v13 = vmul.f32 %v2611_v11, %v1415_v60 }
0x1c4c   :  { %v1508_v56 = vpop.permute.xlu0 %1507 }
0x1c4d   :  { %v1510_v12 = vmul.f32 %v2611_v11, %v1508_v56 }
0x1c4f   :  { %1512 = vrot.lane.b32.xlu1 %v1510_v12, %s2682_s3 }
0x1cc1   :  { %v1513_v14 = vpop.permute.xlu1 %1512 }
0x1cc2   :  { %v1515_v15 = vadd.f32 %v1513_v14, %v1505_v13  ;;  %v1124_v13 = vadd.f32 %v3080_v42, %v3033_v46  ;;  %v1925_v42 = vld [vmem:[%s3205_s7 + $0x18] sm:$0xff] }
0x1cc4   :  { %2612 = vtanh.f32 %v1515_v15 }
0x1cd1   :  { %v2613_v16 = vpop.eup %2612 }
0x1cd2   :  { %1518 = vrot.lane.b32.xlu0 %v2613_v16, %s2681_s17 }
0x1d44   :  { %v1519_v17 = vpop.permute.xlu0 %1518 }
0x1d45   :  { %v1521_v18 = vmul.f32 %v2611_v11, %v1519_v17 }
0x1d47   :  { %1523 = vrot.lane.b32.xlu1 %v1521_v18, %s2682_s3 }
0x1db9   :  { %v1524_v20 = vpop.permute.xlu1 %1523 }
0x1dba   :  { %2454 = vmatmul.mubr.msk.f32.vlgmr.msra.gmra.mxu0 %vm203_vm2, %v1524_v20 }
0x1dbb   :  { %2468 = vmatpush3.msra.mxu0 %v2977_v33  ;;  %2475 = vmatprep.mubr.msk.f32.mxu0 %vm2680_vm0, %v2679_v0 }
0x1dbc   :  { %2469 = vmatprep.subr.mxu0 %v2679_v0 }
0x1dbd   :  { %2470 = vmatpush3.msra.mxu0 %v2983_v34 }
0x1dbe   :  { %2471 = vmatprep.subr.mxu0 %v2679_v0 }
0x1dbf   :  { %2472 = vmatpush3.msra.mxu0 %v2990_v35 }
0x1dc0   :  { %2473 = vmatprep.subr.mxu0 %v2679_v0 }
0x1dc1   :  { %2474 = vmatpush3.msra.mxu0 %v2997_v36 }
0x1dc2   :  { %2489 = vmatprep.subr.mxu0 %v2679_v0 }
0x1e7a   :  { %v1593_v21 = vpop.f32.mrf.mxu0 }
0x1e7b   :  { %v1597_v22 = vadd.f32 %v1593_v21, %v1109_v29 }
0x1e7c   :  { %v2455_v23 = vpop.f32.mrf.mxu0 }
0x1e7d   :  { %2614 = vtanh.f32 %v1597_v22  ;;  %v2152_v24 = vmul.f32 -1.442695, %v1597_v22 }
0x1e7f   :  { %2616 = vpow2.f32 %v2152_v24 }
0x1e8a   :  { %v2615_v53 = vpop.eup %2614 }
0x1e8b   :  { %1607 = vrot.lane.b32.xlu0 %v2615_v53, %s2681_s17 }
0x1e8c   :  { %v2617_v19 = vpop.eup %2616 }
0x1e8d   :  { %v1601_v25 = vadd.f32 1.0, %v2617_v19  ;;  %v1924_v19 = vld [vmem:[%s3205_s7 + $0x10] sm:$0xff] }
0x1e8f   :  { %2618 = vrcp.f32 %v1601_v25  ;;  %v1923_v25 = vld [vmem:[%s3205_s7 + $0x8] sm:$0xff] }
0x1e9c   :  { %v2619_v26 = vpop.eup %2618 }
0x1e9d   :  { %v1605_v30 = vmul.f32 %v2619_v26, %v1515_v15 }
0x1efd   :  { %v1608_v27 = vpop.permute.xlu0 %1607 }
0x1efe   :  { %v1610_v28 = vmul.f32 %v2619_v26, %v1608_v27 }
0x1f00   :  { %1612 = vrot.lane.b32.xlu1 %v1610_v28, %s2682_s3 }
0x1f72   :  { %v1613_v31 = vpop.permute.xlu1 %1612 }
0x1f73   :  { %v1615_v59 = vadd.f32 %v1613_v31, %v1605_v30 }
0x1f75   :  { %2620 = vtanh.f32 %v1615_v59 }
0x1f82   :  { %v2621_v32 = vpop.eup %2620 }
0x1f83   :  { %1618 = vrot.lane.b32.xlu0 %v2621_v32, %s2681_s17  ;;  %v2016_v32 = vld [vmem:[%s3207_s9 + $0x10] sm:$0xff] }
0x1ff5   :  { %v1619_v37 = vpop.permute.xlu0 %1618 }
0x1ff6   :  { %v1621_v38 = vmul.f32 %v2619_v26, %v1619_v37  ;;  %v1922_v26 = vld [vmem:[%s3205_s7] sm:$0xff]  ;;  %v2015_v37 = vld [vmem:[%s3207_s9 + $0x8] sm:$0xff] }
0x1ff8   :  { %1623 = vrot.lane.b32.xlu1 %v1621_v38, %s2682_s3  ;;  %v2014_v38 = vld [vmem:[%s3207_s9] sm:$0xff] }
0x206a   :  { %v1624_v39 = vpop.permute.xlu1 %1623 }
0x206b   :  { %2465 = vmatmul.mubr.msk.f32.vlgmr.msra.gmra.mxu1 %vm203_vm2, %v1624_v39  ;;  %v2159_v39 = vld [vmem:[%s3206_s8] ss:$0 sm:$0xff] }
0x206c   :  { %2479 = vmatpush3.msra.mxu1 %v2977_v33  ;;  %2486 = vmatprep.mubr.msk.f32.mxu1 %vm2680_vm0, %v2679_v0  ;;  %v1114_v33 = vadd.f32 %v3076_v40, %v3033_v46 }
0x206d   :  { %2480 = vmatprep.subr.mxu1 %v2679_v0 }
0x206e   :  { %2481 = vmatpush3.msra.mxu1 %v2983_v34 }
0x206f   :  { %2482 = vmatprep.subr.mxu1 %v2679_v0 }
0x2070   :  { %2483 = vmatpush3.msra.mxu1 %v2990_v35 }
0x2071   :  { %2484 = vmatprep.subr.mxu1 %v2679_v0 }
0x2072   :  { %2485 = vmatpush3.msra.mxu1 %v2997_v36 }
0x2073   :  { %2500 = vmatprep.subr.mxu1 %v2679_v0 }
0x212b   :  { %v1693_v41 = vpop.f32.mrf.mxu1 }
0x212c   :  { %v1697_v44 = vadd.f32 %v1693_v41, %v1114_v33 }
0x212d   :  { %v2466_v45 = vpop.f32.mrf.mxu1 }
0x212e   :  { %2622 = vtanh.f32 %v1697_v44  ;;  %v2154_v34 = vmul.f32 -1.442695, %v1697_v44 }
0x2130   :  { %2624 = vpow2.f32 %v2154_v34 }
0x213b   :  { %v2623_v47 = vpop.eup %2622 }
0x213c   :  { %1707 = vrot.lane.b32.xlu0 %v2623_v47, %s2681_s17 }
0x213d   :  { %v2625_v48 = vpop.eup %2624 }
0x213e   :  { %v1701_v35 = vadd.f32 1.0, %v2625_v48 }
0x2140   :  { %2626 = vrcp.f32 %v1701_v35 }
0x214d   :  { %v2627_v49 = vpop.eup %2626 }
0x214e   :  { %v1705_v51 = vmul.f32 %v2627_v49, %v1615_v59  ;;  %v2017_v59 = vld [vmem:[%s3207_s9 + $0x18] sm:$0xff] }
0x21ae   :  { %v1708_v50 = vpop.permute.xlu0 %1707 }
0x21af   :  { %v1710_v36 = vmul.f32 %v2627_v49, %v1708_v50 }
0x21b1   :  { %1712 = vrot.lane.b32.xlu1 %v1710_v36, %s2682_s3 }
0x2223   :  { %v1713_v10 = vpop.permute.xlu1 %1712 }
0x2224   :  { %v1715_v40 = vadd.f32 %v1713_v10, %v1705_v51 }
0x2226   :  { %2628 = vtanh.f32 %v1715_v40 }
0x2233   :  { %v2629_v58 = vpop.eup %2628 }
0x2234   :  { %1718 = vrot.lane.b32.xlu0 %v2629_v58, %s2681_s17 }
0x22a6   :  { %v1719_v52 = vpop.permute.xlu0 %1718 }
0x22a7   :  { %v1721_v54 = vmul.f32 %v2627_v49, %v1719_v52 }
0x22a9   :  { %1723 = vrot.lane.b32.xlu1 %v1721_v54, %s2682_s3 }
0x231b   :  { %v1724_v55 = vpop.permute.xlu1 %1723 }
0x231c   :  { %2476 = vmatmul.mubr.msk.f32.vlgmr.msra.gmra.mxu0 %vm203_vm2, %v1724_v55 }
0x231d   :  { %2497 = vmatprep.mubr.msk.f32.mxu0 %vm2680_vm0, %v2679_v0  ;;  %2490 = vmatpush3.msra.mxu0 %v1925_v42 }
0x231e   :  { %2491 = vmatprep.subr.mxu0 %v2679_v0 }
0x231f   :  { %2492 = vmatpush3.msra.mxu0 %v1924_v19 }
0x2320   :  { %2493 = vmatprep.subr.mxu0 %v2679_v0 }
0x2321   :  { %2494 = vmatpush3.msra.mxu0 %v1923_v25 }
0x2322   :  { %2495 = vmatprep.subr.mxu0 %v2679_v0 }
0x2323   :  { %2496 = vmatpush3.msra.mxu0 %v1922_v26 }
0x23dc   :  { %v1793_v60 = vpop.f32.mrf.mxu0 }
0x23dd   :  { %v1797_v2 = vadd.f32 %v1793_v60, %v1119_v57 }
0x23de   :  { %v2477_v61 = vpop.f32.mrf.mxu0 }
0x23df   :  { %2630 = vtanh.f32 %v1797_v2  ;;  %v2156_v63 = vmul.f32 -1.442695, %v1797_v2 }
0x23e1   :  { %2632 = vpow2.f32 %v2156_v63 }
0x23ec   :  { %v2631_v62 = vpop.eup %2630 }
0x23ed   :  { %1807 = vrot.lane.b32.xlu0 %v2631_v62, %s2681_s17 }
0x23ee   :  { %v2633_v1 = vpop.eup %2632 }
0x23ef   :  { %v1801_v4 = vadd.f32 1.0, %v2633_v1 }
0x23f1   :  { %2634 = vrcp.f32 %v1801_v4 }
0x23fe   :  { %v2635_v3 = vpop.eup %2634 }
0x23ff   :  { %v1805_v6 = vmul.f32 %v2635_v3, %v1715_v40 }
0x245f   :  { %v1808_v7 = vpop.permute.xlu0 %1807 }
0x2460   :  { %v1810_v5 = vmul.f32 %v2635_v3, %v1808_v7 }
0x2462   :  { %1812 = vrot.lane.b32.xlu1 %v1810_v5, %s2682_s3 }
0x24d4   :  { %v1813_v8 = vpop.permute.xlu1 %1812 }
0x24d5   :  { %v1815_v43 = vadd.f32 %v1813_v8, %v1805_v6 }
0x24d7   :  { %2636 = vtanh.f32 %v1815_v43 }
0x24e4   :  { %v2637_v9 = vpop.eup %2636 }
0x24e5   :  { %1818 = vrot.lane.b32.xlu0 %v2637_v9, %s2681_s17 }
0x2557   :  { %v1819_v11 = vpop.permute.xlu0 %1818 }
0x2558   :  { %v1821_v56 = vmul.f32 %v2635_v3, %v1819_v11 }
0x255a   :  { %1823 = vrot.lane.b32.xlu1 %v1821_v56, %s2682_s3 }
0x25cc   :  { %v1824_v12 = vpop.permute.xlu1 %1823 }
0x25cd   :  { %2487 = vmatmul.mubr.msk.f32.vlgmr.msra.gmra.mxu1 %vm203_vm2, %v1824_v12 }
0x25ce   :  { %2508 = vmatprep.mubr.msk.f32.mxu1 %vm2680_vm0, %v2679_v0  ;;  %2501 = vmatpush3.msra.mxu1 %v2017_v59 }
0x25cf   :  { %2502 = vmatprep.subr.mxu1 %v2679_v0 }
0x25d0   :  { %2503 = vmatpush3.msra.mxu1 %v2016_v32 }
0x25d1   :  { %2504 = vmatprep.subr.mxu1 %v2679_v0 }
0x25d2   :  { %2505 = vmatpush3.msra.mxu1 %v2015_v37 }
0x25d3   :  { %2506 = vmatprep.subr.mxu1 %v2679_v0  ;;  %v2162_v0 = vld [vmem:[%s3208_s10] ss:$0 sm:$0xff] }
0x25d4   :  { %2507 = vmatpush3.msra.mxu1 %v2014_v38 }
0x268d   :  { %v1893_v14 = vpop.f32.mrf.mxu1 }
0x268e   :  { %v1897_v15 = vadd.f32 %v1893_v14, %v1124_v13 }
0x268f   :  { %v2488_v16 = vpop.f32.mrf.mxu1 }
0x2690   :  { %2638 = vtanh.f32 %v1897_v15  ;;  %v2158_v18 = vmul.f32 -1.442695, %v1897_v15 }
0x2692   :  { %2640 = vpow2.f32 %v2158_v18 }
0x269d   :  { %v2639_v17 = vpop.eup %2638 }
0x269e   :  { %1907 = vrot.lane.b32.xlu0 %v2639_v17, %s2681_s17 }
0x269f   :  { %v2641_v20 = vpop.eup %2640 }
0x26a0   :  { %v1901_v29 = vadd.f32 1.0, %v2641_v20 }
0x26a2   :  { %2642 = vrcp.f32 %v1901_v29 }
0x26af   :  { %v2643_v21 = vpop.eup %2642 }
0x26b0   :  { %v1905_v53 = vmul.f32 %v2643_v21, %v1815_v43 }
0x2710   :  { %v1908_v22 = vpop.permute.xlu0 %1907 }
0x2711   :  { %v1910_v23 = vmul.f32 %v2643_v21, %v1908_v22 }
0x2713   :  { %1912 = vrot.lane.b32.xlu1 %v1910_v23, %s2682_s3 }
0x2785   :  { %v1913_v24 = vpop.permute.xlu1 %1912 }
0x2786   :  { %v1915_v46 = vadd.f32 %v1913_v24, %v1905_v53 }
0x2788   :  { %2644 = vtanh.f32 %v1915_v46 }
0x2795   :  { %v2645_v27 = vpop.eup %2644 }
0x2796   :  { %1918 = vrot.lane.b32.xlu0 %v2645_v27, %s2681_s17 }
0x2808   :  { %v1919_v28 = vpop.permute.xlu0 %1918 }
0x2809   :  { %v1921_v30 = vmul.f32 %v2643_v21, %v1919_v28 }
0x280b   :  { %1934 = vrot.lane.b32.xlu1 %v1921_v30, %s2682_s3 }
0x287d   :  { %v1935_v31 = vpop.permute.xlu1 %1934 }
0x287e   :  { %2498 = vmatmul.mubr.msk.f32.vlgmr.msra.gmra.mxu0 %vm203_vm2, %v1935_v31 }
0x293e   :  { %v2004_v33 = vpop.f32.mrf.mxu0 }
0x293f   :  { %v2005_v41 = vadd.f32 %v2159_v39, %v2004_v33 }
0x2940   :  { %v2499_v44 = vpop.f32.mrf.mxu0 }
0x2941   :  { %v2161_v45 = vmul.f32 -1.442695, %v2005_v41 }
0x2943   :  { %2646 = vpow2.f32 %v2161_v45 }
0x2950   :  { %v2647_v47 = vpop.eup %2646 }
0x2951   :  { %v2011_v34 = vadd.f32 1.0, %v2647_v47 }
0x2953   :  { %2648 = vrcp.f32 %v2011_v34 }
0x2960   :  { %v2649_v48 = vpop.eup %2648 }
0x2961   :  { %2509 = vmatmul.mubr.msk.f32.vlgmr.msra.gmra.mxu1 %vm203_vm2, %v2649_v48 }
0x2a21   :  { %v2094_v35 = vpop.f32.mrf.mxu1 }
0x2a22   :  { %v2095_v49 = vadd.f32 %v2162_v0, %v2094_v35 }
0x2a23   :  { %v2510_v50 = vpop.f32.mrf.mxu1 }
0x2a24   :  { %v2164_v36 = vmul.f32 -1.442695, %v2095_v49 }
0x2a26   :  { %2650 = vpow2.f32 %v2164_v36 }
0x2a33   :  { %v2651_v51 = vpop.eup %2650 }
0x2a34   :  { %v2101_v10 = vadd.f32 1.0, %v2651_v51 }
0x2a36   :  { %2652 = vrcp.f32 %v2101_v10 }
0x2a43   :  { %v2653_v40 = vpop.eup %2652 }
0x2a44   :  { %2105 = vst.msk [vmem:[%s3209_s11] sm:$0xff] %vm2104_vm3, %v2653_v40 }
0x2a45   :  { %2110 = vsyncpa [#allocation3], 1 }

</bundles_post_ra>
